<compile_context>
chip_gen: v6e
topology: v6e:2x2x1
jax: 0.10.0
libtpu: 0.0.40
codegen_flags: <defaults>
</compile_context>

<pallas_src>
import jax
import jax.numpy as jnp
from jax.experimental import pallas as pl
from jax.experimental.pallas import tpu as pltpu

# ---------------- model hyper-params (small, forward-consistent) -------------
VOCAB = 16
N_HIDDEN = 32
N_LAYERS = 3
BATCH = 2
SEQ = 8


# --------------------------- fused forward kernel -----------------------------
def music_rnn_kernel(x2d_ref, h0_ref, c0_ref,
                     wih0t_ref, wbig_ref, bias_ref,
                     fcwt_ref, fcb_ref,
                     logits_ref, hn_ref, cn_ref,
                     seq2_ref):
    """Single-invocation kernel (no grid).

    x2d_ref  : (T*B, V)    time-major flattened input (row = t*B + b), B = padded batch
    h0/c0    : (L, B, H)   initial states
    wih0t_ref: (V, 4H)     layer-0 input weights, pre-transposed (f32)
    wbig_ref : (3H, 12H)   combined recurrent + inter-layer weights (bf16):
                             [0:H,   0:4H ] = Whh0^T
                             [0:H,  4H:8H ] = Wih1^T   [H:2H, 4H:8H ] = Whh1^T
                             [H:2H, 8H:12H] = Wih2^T   [2H:3H,8H:12H] = Whh2^T
    bias_ref : (1, 12H)    per-layer combined biases (b_ih + b_hh), concatenated
    fcwt_ref : (H, V)      pre-transposed FC weight, fcb_ref: (1, V)
    logits   : (T*B, V)    time-major logits (row order fixed up in the wrapper)
    hn/cn    : (L, B, H)   final states
    seq2_ref : (T*B, H)    VMEM scratch: layer-2 hidden sequence for deferred FC
    """
    L, B, H = h0_ref.shape
    T = x2d_ref.shape[0] // B
    H4 = 4 * H

    # ---- bulk layer-0 input contribution for the WHOLE sequence: one MXU push,
    # off the serialized recurrent chain (kept f32) ----
    xg0 = jnp.dot(x2d_ref[...], wih0t_ref[...],
                  preferred_element_type=jnp.float32)            # (T*B, 4H)

    wbig = wbig_ref[...]                                         # (3H, 12H) bf16
    bias = bias_ref[...]                                         # (1, 12H)  f32

    # running per-layer states held in vregs across the (static) unrolled loop
    h = [h0_ref[l] for l in range(L)]                            # each (B, H) f32
    c = [c0_ref[l] for l in range(L)]

    # ---- wavefront (diagonal) schedule: layer l processes time t = w - l ----
    for w in range(T + L - 1):
        # ONE combined recurrent matmul for all layers (bf16 operands, f32 acc)
        h_stack = jnp.concatenate(h, axis=-1).astype(jnp.bfloat16)   # (B, 3H)
        gates_all = jnp.dot(h_stack, wbig,
                            preferred_element_type=jnp.float32) + bias  # (B, 12H)

        for l in range(L):
            t = w - l
            if t < 0 or t >= T:          # static edge handling of the wavefront
                continue
            g = gates_all[:, l * H4:(l + 1) * H4]                # lane-aligned slice
            if l == 0:
                g = g + xg0[t * B:(t + 1) * B, :]                # sublane-aligned
            # full-width activations (EUP), gates sliced afterwards
            sig = jax.nn.sigmoid(g)
            th = jnp.tanh(g)
            i_g = sig[:, 0 * H:1 * H]
            f_g = sig[:, 1 * H:2 * H]
            g_g = th[:, 2 * H:3 * H]
            o_g = sig[:, 3 * H:4 * H]
            c_new = f_g * c[l] + i_g * g_g
            h_new = o_g * jnp.tanh(c_new)
            c[l] = c_new
            h[l] = h_new
            if l == L - 1:
                # full 8-sublane tile store (B is padded to 8 in the wrapper)
                seq2_ref[t * B:(t + 1) * B, :] = h_new

    # final states written exactly once per layer
    for l in range(L):
        hn_ref[l] = h[l]
        cn_ref[l] = c[l]

    # ---- deferred FC: one bulk (T*B, H) @ (H, V) matmul, single store ----
    logits_ref[...] = (jnp.dot(seq2_ref[...], fcwt_ref[...],
                               preferred_element_type=jnp.float32)
                       + fcb_ref[...])


# ------------------------- one-time weight preparation ------------------------
def prepare_params(params):
    """Pre-transpose / pre-pack weights ONCE (outside the hot forward path)."""
    H = N_HIDDEN
    (wih0, whh0, b0), (wih1, whh1, b1), (wih2, whh2, b2) = params["lstm"]

    wbig = jnp.zeros((3 * H, 12 * H), jnp.float32)
    wbig = wbig.at[0:H,       0 * H:4 * H].set(whh0.T)
    wbig = wbig.at[0:H,       4 * H:8 * H].set(wih1.T)
    wbig = wbig.at[H:2 * H,   4 * H:8 * H].set(whh1.T)
    wbig = wbig.at[H:2 * H,   8 * H:12 * H].set(wih2.T)
    wbig = wbig.at[2 * H:3 * H, 8 * H:12 * H].set(whh2.T)

    return {
        "wih0_t": wih0.T,                                   # (V, 4H)  f32
        "w_big": wbig.astype(jnp.bfloat16),                 # (3H,12H) bf16 (MXU-native)
        "bias": jnp.concatenate([b0, b1, b2]).reshape(1, 12 * H),  # (1,12H) f32
        "fc_wt": params["fc_w"].T,                          # (H, V)   f32
        "fc_b": params["fc_b"].reshape(1, VOCAB),           # (1, V)   f32
    }


# ------------------------------ full forward ---------------------------------
@jax.jit
def music_rnn_forward(prepped, x, hidden_init):
    """x: (B, T, V).  hidden_init: (h0, c0) each (L, B, H).
    Returns (logits (B*T, V), (h_n, c_n)) — matches PyTorch musicRNN.forward."""
    B, T, V = x.shape
    H, L = N_HIDDEN, N_LAYERS
    h0, c0 = hidden_init

    # Pad batch to a full sublane tile (>= 8) so per-step loads/stores are
    # tile-aligned and MXU rows are filled; padded rows are discarded below.
    B_pad = max(8, ((B + 7) // 8) * 8)
    if B_pad != B:
        x = jnp.pad(x, ((0, B_pad - B), (0, 0), (0, 0)))
        h0 = jnp.pad(h0, ((0, 0), (0, B_pad - B), (0, 0)))
        c0 = jnp.pad(c0, ((0, 0), (0, B_pad - B), (0, 0)))

    # time-major flatten: row = t*B_pad + b
    x2d = jnp.transpose(x, (1, 0, 2)).reshape(T * B_pad, V)

    vmem = pl.BlockSpec(memory_space=pltpu.MemorySpace.VMEM)
    logits_tm, h_n, c_n = pl.pallas_call(
        music_rnn_kernel,
        out_shape=(jax.ShapeDtypeStruct((T * B_pad, V), jnp.float32),
                   jax.ShapeDtypeStruct((L, B_pad, H), jnp.float32),
                   jax.ShapeDtypeStruct((L, B_pad, H), jnp.float32)),
        in_specs=[vmem] * 8,
        out_specs=(vmem, vmem, vmem),
        scratch_shapes=[pltpu.VMEM((T * B_pad, H), jnp.float32)],
    )(x2d, h0, c0,
      prepped["wih0_t"], prepped["w_big"], prepped["bias"],
      prepped["fc_wt"], prepped["fc_b"])

    # (T*B_pad, V) time-major -> PyTorch row order b*T + t (tiny wrapper-side fix-up)
    logits = (logits_tm.reshape(T, B_pad, V)[:, :B, :]
              .transpose(1, 0, 2).reshape(B * T, V))
    return logits, (h_n[:, :B, :], c_n[:, :B, :])


# --------------------------- deterministic params -----------------------------
def init_params(key):
    scale = 1.0 / jnp.sqrt(N_HIDDEN)
    params = {"lstm": []}
    for layer in range(N_LAYERS):
        in_feat = VOCAB if layer == 0 else N_HIDDEN
        key, k1, k2, k3, k4 = jax.random.split(key, 5)
        wih = jax.random.uniform(k1, (4 * N_HIDDEN, in_feat), jnp.float32, -scale, scale)
        whh = jax.random.uniform(k2, (4 * N_HIDDEN, N_HIDDEN), jnp.float32, -scale, scale)
        b_ih = jax.random.uniform(k3, (4 * N_HIDDEN,), jnp.float32, -scale, scale)
        b_hh = jax.random.uniform(k4, (4 * N_HIDDEN,), jnp.float32, -scale, scale)
        params["lstm"].append((wih, whh, b_ih + b_hh))
    key, k1, k2 = jax.random.split(key, 3)
    params["fc_w"] = jax.random.uniform(k1, (VOCAB, N_HIDDEN), jnp.float32, -scale, scale)
    params["fc_b"] = jax.random.uniform(k2, (VOCAB,), jnp.float32, -scale, scale)
    return params


# ------------------------------ pure-JAX reference ----------------------------
def reference_forward(params, x, hidden_init):
    B, T, V = x.shape
    h0, c0 = hidden_init
    inp = x
    h_fin, c_fin = [], []
    for layer in range(N_LAYERS):
        wih, whh, b = params["lstm"][layer]
        h, c = h0[layer], c0[layer]
        outs = []
        for t in range(T):
            g = inp[:, t, :] @ wih.T + h @ whh.T + b
            H = N_HIDDEN
            i = jax.nn.sigmoid(g[:, :H]); f = jax.nn.sigmoid(g[:, H:2 * H])
            gg = jnp.tanh(g[:, 2 * H:3 * H]); o = jax.nn.sigmoid(g[:, 3 * H:])
            c = f * c + i * gg
            h = o * jnp.tanh(c)
            outs.append(h)
        inp = jnp.stack(outs, axis=1)
        h_fin.append(h); c_fin.append(c)
    out = inp.reshape(-1, N_HIDDEN) @ params["fc_w"].T + params["fc_b"]
    return out, (jnp.stack(h_fin), jnp.stack(c_fin))


# ----------------------------------- main -------------------------------------
if __name__ == "__main__":
    key = jax.random.PRNGKey(0)
    kp, kx = jax.random.split(key)
    params = init_params(kp)
    prepped = prepare_params(params)          # one-time layout prep (off hot path)

    x = jax.random.normal(kx, (BATCH, SEQ, VOCAB), jnp.float32)
    h0 = jnp.zeros((N_LAYERS, BATCH, N_HIDDEN), jnp.float32)
    c0 = jnp.zeros((N_LAYERS, BATCH, N_HIDDEN), jnp.float32)

    logits, (h_n, c_n) = music_rnn_forward(prepped, x, (h0, c0))
    jax.block_until_ready((logits, h_n, c_n))

    ref_logits, (ref_h, ref_c) = reference_forward(params, x, (h0, c0))
    assert logits.shape == (BATCH * SEQ, VOCAB)
    assert h_n.shape == (N_LAYERS, BATCH, N_HIDDEN)
    assert c_n.shape == (N_LAYERS, BATCH, N_HIDDEN)
    # tolerances loosened because the recurrent matmul runs with bf16 operands
    assert jnp.allclose(logits, ref_logits, atol=5e-2, rtol=5e-2)
    assert jnp.allclose(h_n, ref_h, atol=5e-2, rtol=5e-2)
    assert jnp.allclose(c_n, ref_c, atol=5e-2, rtol=5e-2)

    print("KERNEL_OK")
</pallas_src>

<mosaic_0001>
module attributes {stable_mosaic.version = 11 : i64} {
  func.func @music_rnn_kernel(%arg0: memref<64x16xf32, #tpu.memory_space<vmem>>, %arg1: memref<3x8x32xf32, #tpu.memory_space<vmem>>, %arg2: memref<3x8x32xf32, #tpu.memory_space<vmem>>, %arg3: memref<16x128xf32, #tpu.memory_space<vmem>>, %arg4: memref<96x384xbf16, #tpu.memory_space<vmem>>, %arg5: memref<1x384xf32, #tpu.memory_space<vmem>>, %arg6: memref<32x16xf32, #tpu.memory_space<vmem>>, %arg7: memref<1x16xf32, #tpu.memory_space<vmem>>, %arg8: memref<64x16xf32, #tpu.memory_space<vmem>>, %arg9: memref<3x8x32xf32, #tpu.memory_space<vmem>>, %arg10: memref<3x8x32xf32, #tpu.memory_space<vmem>>, %arg11: memref<64x32xf32, #tpu.memory_space<vmem>>) attributes {dimension_semantics = [], scalar_prefetch = 0 : i64, scratch_operands = 1 : i64, tpu.core_type = #tpu.core_type<tc>} {
    %c0 = arith.constant 0 : index
    %c0_0 = arith.constant 0 : index
    %0 = vector.load %arg0[%c0, %c0_0] : memref<64x16xf32, #tpu.memory_space<vmem>>, vector<64x16xf32>
    %c0_1 = arith.constant 0 : index
    %c0_2 = arith.constant 0 : index
    %1 = vector.load %arg3[%c0_1, %c0_2] : memref<16x128xf32, #tpu.memory_space<vmem>>, vector<16x128xf32>
    %cst = arith.constant dense<0.000000e+00> : vector<64x128xf32>
    %2 = tpu.matmul %0, %1, %cst {dimension_numbers = #tpu.dot_dimension_numbers<[1], [0], [0], [1], [0, 0, 1, 1], [], []>} : vector<64x16xf32>, vector<16x128xf32>, vector<64x128xf32> -> vector<64x128xf32>
    %c0_3 = arith.constant 0 : index
    %c0_4 = arith.constant 0 : index
    %3 = vector.load %arg4[%c0_3, %c0_4] : memref<96x384xbf16, #tpu.memory_space<vmem>>, vector<96x384xbf16>
    %c0_5 = arith.constant 0 : index
    %c0_6 = arith.constant 0 : index
    %4 = vector.load %arg5[%c0_5, %c0_6] : memref<1x384xf32, #tpu.memory_space<vmem>>, vector<1x384xf32>
    %c0_7 = arith.constant 0 : index
    %c0_8 = arith.constant 0 : index
    %c0_9 = arith.constant 0 : index
    %5 = vector.load %arg1[%c0_7, %c0_8, %c0_9] : memref<3x8x32xf32, #tpu.memory_space<vmem>>, vector<1x8x32xf32>
    %6 = vector.shape_cast %5 : vector<1x8x32xf32> to vector<8x32xf32>
    %c1 = arith.constant 1 : index
    %c0_10 = arith.constant 0 : index
    %c0_11 = arith.constant 0 : index
    %7 = vector.load %arg1[%c1, %c0_10, %c0_11] : memref<3x8x32xf32, #tpu.memory_space<vmem>>, vector<1x8x32xf32>
    %8 = vector.shape_cast %7 : vector<1x8x32xf32> to vector<8x32xf32>
    %c2 = arith.constant 2 : index
    %c0_12 = arith.constant 0 : index
    %c0_13 = arith.constant 0 : index
    %9 = vector.load %arg1[%c2, %c0_12, %c0_13] : memref<3x8x32xf32, #tpu.memory_space<vmem>>, vector<1x8x32xf32>
    %10 = vector.shape_cast %9 : vector<1x8x32xf32> to vector<8x32xf32>
    %c0_14 = arith.constant 0 : index
    %c0_15 = arith.constant 0 : index
    %c0_16 = arith.constant 0 : index
    %11 = vector.load %arg2[%c0_14, %c0_15, %c0_16] : memref<3x8x32xf32, #tpu.memory_space<vmem>>, vector<1x8x32xf32>
    %12 = vector.shape_cast %11 : vector<1x8x32xf32> to vector<8x32xf32>
    %c1_17 = arith.constant 1 : index
    %c0_18 = arith.constant 0 : index
    %c0_19 = arith.constant 0 : index
    %13 = vector.load %arg2[%c1_17, %c0_18, %c0_19] : memref<3x8x32xf32, #tpu.memory_space<vmem>>, vector<1x8x32xf32>
    %14 = vector.shape_cast %13 : vector<1x8x32xf32> to vector<8x32xf32>
    %c2_20 = arith.constant 2 : index
    %c0_21 = arith.constant 0 : index
    %c0_22 = arith.constant 0 : index
    %15 = vector.load %arg2[%c2_20, %c0_21, %c0_22] : memref<3x8x32xf32, #tpu.memory_space<vmem>>, vector<1x8x32xf32>
    %16 = vector.shape_cast %15 : vector<1x8x32xf32> to vector<8x32xf32>
    %17 = tpu.concatenate %6, %8, %10 in 1 : vector<8x32xf32>, vector<8x32xf32>, vector<8x32xf32> -> vector<8x96xf32>
    %18 = arith.truncf %17 : vector<8x96xf32> to vector<8x96xbf16>
    %cst_23 = arith.constant dense<0.000000e+00> : vector<8x384xf32>
    %19 = tpu.matmul %18, %3, %cst_23 {dimension_numbers = #tpu.dot_dimension_numbers<[1], [0], [0], [1], [0, 0, 1, 1], [], []>} : vector<8x96xbf16>, vector<96x384xbf16>, vector<8x384xf32> -> vector<8x384xf32>
    %20 = vector.broadcast %4 : vector<1x384xf32> to vector<8x384xf32>
    %21 = arith.addf %19, %20 : vector<8x384xf32>
    %22 = vector.extract_strided_slice %21 {offsets = [0, 0], sizes = [8, 128], strides = [1, 1]} : vector<8x384xf32> to vector<8x128xf32>
    %23 = vector.extract_strided_slice %2 {offsets = [0, 0], sizes = [8, 128], strides = [1, 1]} : vector<64x128xf32> to vector<8x128xf32>
    %24 = arith.addf %22, %23 : vector<8x128xf32>
    %25 = arith.negf %24 : vector<8x128xf32>
    %26 = math.exp %25 : vector<8x128xf32>
    %cst_24 = arith.constant 1.000000e+00 : f32
    %27 = vector.broadcast %cst_24 : f32 to vector<8x128xf32>
    %28 = arith.addf %27, %26 : vector<8x128xf32>
    %29 = arith.divf %27, %28 : vector<8x128xf32>
    %30 = math.tanh %24 : vector<8x128xf32>
    %31 = vector.extract_strided_slice %29 {offsets = [0, 0], sizes = [8, 32], strides = [1, 1]} : vector<8x128xf32> to vector<8x32xf32>
    %32 = vector.extract_strided_slice %29 {offsets = [0, 32], sizes = [8, 32], strides = [1, 1]} : vector<8x128xf32> to vector<8x32xf32>
    %33 = vector.extract_strided_slice %30 {offsets = [0, 64], sizes = [8, 32], strides = [1, 1]} : vector<8x128xf32> to vector<8x32xf32>
    %34 = vector.extract_strided_slice %29 {offsets = [0, 96], sizes = [8, 32], strides = [1, 1]} : vector<8x128xf32> to vector<8x32xf32>
    %35 = arith.mulf %32, %12 : vector<8x32xf32>
    %36 = arith.mulf %31, %33 : vector<8x32xf32>
    %37 = arith.addf %35, %36 : vector<8x32xf32>
    %38 = math.tanh %37 : vector<8x32xf32>
    %39 = arith.mulf %34, %38 : vector<8x32xf32>
    %40 = tpu.concatenate %39, %8, %10 in 1 : vector<8x32xf32>, vector<8x32xf32>, vector<8x32xf32> -> vector<8x96xf32>
    %41 = arith.truncf %40 : vector<8x96xf32> to vector<8x96xbf16>
    %cst_25 = arith.constant dense<0.000000e+00> : vector<8x384xf32>
    %42 = tpu.matmul %41, %3, %cst_25 {dimension_numbers = #tpu.dot_dimension_numbers<[1], [0], [0], [1], [0, 0, 1, 1], [], []>} : vector<8x96xbf16>, vector<96x384xbf16>, vector<8x384xf32> -> vector<8x384xf32>
    %43 = vector.broadcast %4 : vector<1x384xf32> to vector<8x384xf32>
    %44 = arith.addf %42, %43 : vector<8x384xf32>
    %45 = vector.extract_strided_slice %44 {offsets = [0, 0], sizes = [8, 128], strides = [1, 1]} : vector<8x384xf32> to vector<8x128xf32>
    %46 = vector.extract_strided_slice %2 {offsets = [8, 0], sizes = [8, 128], strides = [1, 1]} : vector<64x128xf32> to vector<8x128xf32>
    %47 = arith.addf %45, %46 : vector<8x128xf32>
    %48 = arith.negf %47 : vector<8x128xf32>
    %49 = math.exp %48 : vector<8x128xf32>
    %cst_26 = arith.constant 1.000000e+00 : f32
    %50 = vector.broadcast %cst_26 : f32 to vector<8x128xf32>
    %51 = arith.addf %50, %49 : vector<8x128xf32>
    %52 = arith.divf %50, %51 : vector<8x128xf32>
    %53 = math.tanh %47 : vector<8x128xf32>
    %54 = vector.extract_strided_slice %52 {offsets = [0, 0], sizes = [8, 32], strides = [1, 1]} : vector<8x128xf32> to vector<8x32xf32>
    %55 = vector.extract_strided_slice %52 {offsets = [0, 32], sizes = [8, 32], strides = [1, 1]} : vector<8x128xf32> to vector<8x32xf32>
    %56 = vector.extract_strided_slice %53 {offsets = [0, 64], sizes = [8, 32], strides = [1, 1]} : vector<8x128xf32> to vector<8x32xf32>
    %57 = vector.extract_strided_slice %52 {offsets = [0, 96], sizes = [8, 32], strides = [1, 1]} : vector<8x128xf32> to vector<8x32xf32>
    %58 = arith.mulf %55, %37 : vector<8x32xf32>
    %59 = arith.mulf %54, %56 : vector<8x32xf32>
    %60 = arith.addf %58, %59 : vector<8x32xf32>
    %61 = math.tanh %60 : vector<8x32xf32>
    %62 = arith.mulf %57, %61 : vector<8x32xf32>
    %63 = vector.extract_strided_slice %44 {offsets = [0, 128], sizes = [8, 128], strides = [1, 1]} : vector<8x384xf32> to vector<8x128xf32>
    %64 = arith.negf %63 : vector<8x128xf32>
    %65 = math.exp %64 : vector<8x128xf32>
    %cst_27 = arith.constant 1.000000e+00 : f32
    %66 = vector.broadcast %cst_27 : f32 to vector<8x128xf32>
    %67 = arith.addf %66, %65 : vector<8x128xf32>
    %68 = arith.divf %66, %67 : vector<8x128xf32>
    %69 = math.tanh %63 : vector<8x128xf32>
    %70 = vector.extract_strided_slice %68 {offsets = [0, 0], sizes = [8, 32], strides = [1, 1]} : vector<8x128xf32> to vector<8x32xf32>
    %71 = vector.extract_strided_slice %68 {offsets = [0, 32], sizes = [8, 32], strides = [1, 1]} : vector<8x128xf32> to vector<8x32xf32>
    %72 = vector.extract_strided_slice %69 {offsets = [0, 64], sizes = [8, 32], strides = [1, 1]} : vector<8x128xf32> to vector<8x32xf32>
    %73 = vector.extract_strided_slice %68 {offsets = [0, 96], sizes = [8, 32], strides = [1, 1]} : vector<8x128xf32> to vector<8x32xf32>
    %74 = arith.mulf %71, %14 : vector<8x32xf32>
    %75 = arith.mulf %70, %72 : vector<8x32xf32>
    %76 = arith.addf %74, %75 : vector<8x32xf32>
    %77 = math.tanh %76 : vector<8x32xf32>
    %78 = arith.mulf %73, %77 : vector<8x32xf32>
    %79 = tpu.concatenate %62, %78, %10 in 1 : vector<8x32xf32>, vector<8x32xf32>, vector<8x32xf32> -> vector<8x96xf32>
    %80 = arith.truncf %79 : vector<8x96xf32> to vector<8x96xbf16>
    %cst_28 = arith.constant dense<0.000000e+00> : vector<8x384xf32>
    %81 = tpu.matmul %80, %3, %cst_28 {dimension_numbers = #tpu.dot_dimension_numbers<[1], [0], [0], [1], [0, 0, 1, 1], [], []>} : vector<8x96xbf16>, vector<96x384xbf16>, vector<8x384xf32> -> vector<8x384xf32>
    %82 = vector.broadcast %4 : vector<1x384xf32> to vector<8x384xf32>
    %83 = arith.addf %81, %82 : vector<8x384xf32>
    %84 = vector.extract_strided_slice %83 {offsets = [0, 0], sizes = [8, 128], strides = [1, 1]} : vector<8x384xf32> to vector<8x128xf32>
    %85 = vector.extract_strided_slice %2 {offsets = [16, 0], sizes = [8, 128], strides = [1, 1]} : vector<64x128xf32> to vector<8x128xf32>
    %86 = arith.addf %84, %85 : vector<8x128xf32>
    %87 = arith.negf %86 : vector<8x128xf32>
    %88 = math.exp %87 : vector<8x128xf32>
    %cst_29 = arith.constant 1.000000e+00 : f32
    %89 = vector.broadcast %cst_29 : f32 to vector<8x128xf32>
    %90 = arith.addf %89, %88 : vector<8x128xf32>
    %91 = arith.divf %89, %90 : vector<8x128xf32>
    %92 = math.tanh %86 : vector<8x128xf32>
    %93 = vector.extract_strided_slice %91 {offsets = [0, 0], sizes = [8, 32], strides = [1, 1]} : vector<8x128xf32> to vector<8x32xf32>
    %94 = vector.extract_strided_slice %91 {offsets = [0, 32], sizes = [8, 32], strides = [1, 1]} : vector<8x128xf32> to vector<8x32xf32>
    %95 = vector.extract_strided_slice %92 {offsets = [0, 64], sizes = [8, 32], strides = [1, 1]} : vector<8x128xf32> to vector<8x32xf32>
    %96 = vector.extract_strided_slice %91 {offsets = [0, 96], sizes = [8, 32], strides = [1, 1]} : vector<8x128xf32> to vector<8x32xf32>
    %97 = arith.mulf %94, %60 : vector<8x32xf32>
    %98 = arith.mulf %93, %95 : vector<8x32xf32>
    %99 = arith.addf %97, %98 : vector<8x32xf32>
    %100 = math.tanh %99 : vector<8x32xf32>
    %101 = arith.mulf %96, %100 : vector<8x32xf32>
    %102 = vector.extract_strided_slice %83 {offsets = [0, 128], sizes = [8, 128], strides = [1, 1]} : vector<8x384xf32> to vector<8x128xf32>
    %103 = arith.negf %102 : vector<8x128xf32>
    %104 = math.exp %103 : vector<8x128xf32>
    %cst_30 = arith.constant 1.000000e+00 : f32
    %105 = vector.broadcast %cst_30 : f32 to vector<8x128xf32>
    %106 = arith.addf %105, %104 : vector<8x128xf32>
    %107 = arith.divf %105, %106 : vector<8x128xf32>
    %108 = math.tanh %102 : vector<8x128xf32>
    %109 = vector.extract_strided_slice %107 {offsets = [0, 0], sizes = [8, 32], strides = [1, 1]} : vector<8x128xf32> to vector<8x32xf32>
    %110 = vector.extract_strided_slice %107 {offsets = [0, 32], sizes = [8, 32], strides = [1, 1]} : vector<8x128xf32> to vector<8x32xf32>
    %111 = vector.extract_strided_slice %108 {offsets = [0, 64], sizes = [8, 32], strides = [1, 1]} : vector<8x128xf32> to vector<8x32xf32>
    %112 = vector.extract_strided_slice %107 {offsets = [0, 96], sizes = [8, 32], strides = [1, 1]} : vector<8x128xf32> to vector<8x32xf32>
    %113 = arith.mulf %110, %76 : vector<8x32xf32>
    %114 = arith.mulf %109, %111 : vector<8x32xf32>
    %115 = arith.addf %113, %114 : vector<8x32xf32>
    %116 = math.tanh %115 : vector<8x32xf32>
    %117 = arith.mulf %112, %116 : vector<8x32xf32>
    %118 = vector.extract_strided_slice %83 {offsets = [0, 256], sizes = [8, 128], strides = [1, 1]} : vector<8x384xf32> to vector<8x128xf32>
    %119 = arith.negf %118 : vector<8x128xf32>
    %120 = math.exp %119 : vector<8x128xf32>
    %cst_31 = arith.constant 1.000000e+00 : f32
    %121 = vector.broadcast %cst_31 : f32 to vector<8x128xf32>
    %122 = arith.addf %121, %120 : vector<8x128xf32>
    %123 = arith.divf %121, %122 : vector<8x128xf32>
    %124 = math.tanh %118 : vector<8x128xf32>
    %125 = vector.extract_strided_slice %123 {offsets = [0, 0], sizes = [8, 32], strides = [1, 1]} : vector<8x128xf32> to vector<8x32xf32>
    %126 = vector.extract_strided_slice %123 {offsets = [0, 32], sizes = [8, 32], strides = [1, 1]} : vector<8x128xf32> to vector<8x32xf32>
    %127 = vector.extract_strided_slice %124 {offsets = [0, 64], sizes = [8, 32], strides = [1, 1]} : vector<8x128xf32> to vector<8x32xf32>
    %128 = vector.extract_strided_slice %123 {offsets = [0, 96], sizes = [8, 32], strides = [1, 1]} : vector<8x128xf32> to vector<8x32xf32>
    %129 = arith.mulf %126, %16 : vector<8x32xf32>
    %130 = arith.mulf %125, %127 : vector<8x32xf32>
    %131 = arith.addf %129, %130 : vector<8x32xf32>
    %132 = math.tanh %131 : vector<8x32xf32>
    %133 = arith.mulf %128, %132 : vector<8x32xf32>
    %c0_32 = arith.constant 0 : index
    %c0_33 = arith.constant 0 : index
    %134 = vector.load %arg11[%c0_32, %c0_33] : memref<64x32xf32, #tpu.memory_space<vmem>>, vector<8x32xf32>
    tpu.vector_store %arg11[%c0_32, %c0_33], %133 {strides = array<i32>} : memref<64x32xf32, #tpu.memory_space<vmem>>, vector<8x32xf32>,
    %135 = tpu.concatenate %101, %117, %133 in 1 : vector<8x32xf32>, vector<8x32xf32>, vector<8x32xf32> -> vector<8x96xf32>
    %136 = arith.truncf %135 : vector<8x96xf32> to vector<8x96xbf16>
    %cst_34 = arith.constant dense<0.000000e+00> : vector<8x384xf32>
    %137 = tpu.matmul %136, %3, %cst_34 {dimension_numbers = #tpu.dot_dimension_numbers<[1], [0], [0], [1], [0, 0, 1, 1], [], []>} : vector<8x96xbf16>, vector<96x384xbf16>, vector<8x384xf32> -> vector<8x384xf32>
    %138 = vector.broadcast %4 : vector<1x384xf32> to vector<8x384xf32>
    %139 = arith.addf %137, %138 : vector<8x384xf32>
    %140 = vector.extract_strided_slice %139 {offsets = [0, 0], sizes = [8, 128], strides = [1, 1]} : vector<8x384xf32> to vector<8x128xf32>
    %141 = vector.extract_strided_slice %2 {offsets = [24, 0], sizes = [8, 128], strides = [1, 1]} : vector<64x128xf32> to vector<8x128xf32>
    %142 = arith.addf %140, %141 : vector<8x128xf32>
    %143 = arith.negf %142 : vector<8x128xf32>
    %144 = math.exp %143 : vector<8x128xf32>
    %cst_35 = arith.constant 1.000000e+00 : f32
    %145 = vector.broadcast %cst_35 : f32 to vector<8x128xf32>
    %146 = arith.addf %145, %144 : vector<8x128xf32>
    %147 = arith.divf %145, %146 : vector<8x128xf32>
    %148 = math.tanh %142 : vector<8x128xf32>
    %149 = vector.extract_strided_slice %147 {offsets = [0, 0], sizes = [8, 32], strides = [1, 1]} : vector<8x128xf32> to vector<8x32xf32>
    %150 = vector.extract_strided_slice %147 {offsets = [0, 32], sizes = [8, 32], strides = [1, 1]} : vector<8x128xf32> to vector<8x32xf32>
    %151 = vector.extract_strided_slice %148 {offsets = [0, 64], sizes = [8, 32], strides = [1, 1]} : vector<8x128xf32> to vector<8x32xf32>
    %152 = vector.extract_strided_slice %147 {offsets = [0, 96], sizes = [8, 32], strides = [1, 1]} : vector<8x128xf32> to vector<8x32xf32>
    %153 = arith.mulf %150, %99 : vector<8x32xf32>
    %154 = arith.mulf %149, %151 : vector<8x32xf32>
    %155 = arith.addf %153, %154 : vector<8x32xf32>
    %156 = math.tanh %155 : vector<8x32xf32>
    %157 = arith.mulf %152, %156 : vector<8x32xf32>
    %158 = vector.extract_strided_slice %139 {offsets = [0, 128], sizes = [8, 128], strides = [1, 1]} : vector<8x384xf32> to vector<8x128xf32>
    %159 = arith.negf %158 : vector<8x128xf32>
    %160 = math.exp %159 : vector<8x128xf32>
    %cst_36 = arith.constant 1.000000e+00 : f32
    %161 = vector.broadcast %cst_36 : f32 to vector<8x128xf32>
    %162 = arith.addf %161, %160 : vector<8x128xf32>
    %163 = arith.divf %161, %162 : vector<8x128xf32>
    %164 = math.tanh %158 : vector<8x128xf32>
    %165 = vector.extract_strided_slice %163 {offsets = [0, 0], sizes = [8, 32], strides = [1, 1]} : vector<8x128xf32> to vector<8x32xf32>
    %166 = vector.extract_strided_slice %163 {offsets = [0, 32], sizes = [8, 32], strides = [1, 1]} : vector<8x128xf32> to vector<8x32xf32>
    %167 = vector.extract_strided_slice %164 {offsets = [0, 64], sizes = [8, 32], strides = [1, 1]} : vector<8x128xf32> to vector<8x32xf32>
    %168 = vector.extract_strided_slice %163 {offsets = [0, 96], sizes = [8, 32], strides = [1, 1]} : vector<8x128xf32> to vector<8x32xf32>
    %169 = arith.mulf %166, %115 : vector<8x32xf32>
    %170 = arith.mulf %165, %167 : vector<8x32xf32>
    %171 = arith.addf %169, %170 : vector<8x32xf32>
    %172 = math.tanh %171 : vector<8x32xf32>
    %173 = arith.mulf %168, %172 : vector<8x32xf32>
    %174 = vector.extract_strided_slice %139 {offsets = [0, 256], sizes = [8, 128], strides = [1, 1]} : vector<8x384xf32> to vector<8x128xf32>
    %175 = arith.negf %174 : vector<8x128xf32>
    %176 = math.exp %175 : vector<8x128xf32>
    %cst_37 = arith.constant 1.000000e+00 : f32
    %177 = vector.broadcast %cst_37 : f32 to vector<8x128xf32>
    %178 = arith.addf %177, %176 : vector<8x128xf32>
    %179 = arith.divf %177, %178 : vector<8x128xf32>
    %180 = math.tanh %174 : vector<8x128xf32>
    %181 = vector.extract_strided_slice %179 {offsets = [0, 0], sizes = [8, 32], strides = [1, 1]} : vector<8x128xf32> to vector<8x32xf32>
    %182 = vector.extract_strided_slice %179 {offsets = [0, 32], sizes = [8, 32], strides = [1, 1]} : vector<8x128xf32> to vector<8x32xf32>
    %183 = vector.extract_strided_slice %180 {offsets = [0, 64], sizes = [8, 32], strides = [1, 1]} : vector<8x128xf32> to vector<8x32xf32>
    %184 = vector.extract_strided_slice %179 {offsets = [0, 96], sizes = [8, 32], strides = [1, 1]} : vector<8x128xf32> to vector<8x32xf32>
    %185 = arith.mulf %182, %131 : vector<8x32xf32>
    %186 = arith.mulf %181, %183 : vector<8x32xf32>
    %187 = arith.addf %185, %186 : vector<8x32xf32>
    %188 = math.tanh %187 : vector<8x32xf32>
    %189 = arith.mulf %184, %188 : vector<8x32xf32>
    %c8 = arith.constant 8 : index
    %c0_38 = arith.constant 0 : index
    %190 = vector.load %arg11[%c8, %c0_38] : memref<64x32xf32, #tpu.memory_space<vmem>>, vector<8x32xf32>
    tpu.vector_store %arg11[%c8, %c0_38], %189 {strides = array<i32>} : memref<64x32xf32, #tpu.memory_space<vmem>>, vector<8x32xf32>,
    %191 = tpu.concatenate %157, %173, %189 in 1 : vector<8x32xf32>, vector<8x32xf32>, vector<8x32xf32> -> vector<8x96xf32>
    %192 = arith.truncf %191 : vector<8x96xf32> to vector<8x96xbf16>
    %cst_39 = arith.constant dense<0.000000e+00> : vector<8x384xf32>
    %193 = tpu.matmul %192, %3, %cst_39 {dimension_numbers = #tpu.dot_dimension_numbers<[1], [0], [0], [1], [0, 0, 1, 1], [], []>} : vector<8x96xbf16>, vector<96x384xbf16>, vector<8x384xf32> -> vector<8x384xf32>
    %194 = vector.broadcast %4 : vector<1x384xf32> to vector<8x384xf32>
    %195 = arith.addf %193, %194 : vector<8x384xf32>
    %196 = vector.extract_strided_slice %195 {offsets = [0, 0], sizes = [8, 128], strides = [1, 1]} : vector<8x384xf32> to vector<8x128xf32>
    %197 = vector.extract_strided_slice %2 {offsets = [32, 0], sizes = [8, 128], strides = [1, 1]} : vector<64x128xf32> to vector<8x128xf32>
    %198 = arith.addf %196, %197 : vector<8x128xf32>
    %199 = arith.negf %198 : vector<8x128xf32>
    %200 = math.exp %199 : vector<8x128xf32>
    %cst_40 = arith.constant 1.000000e+00 : f32
    %201 = vector.broadcast %cst_40 : f32 to vector<8x128xf32>
    %202 = arith.addf %201, %200 : vector<8x128xf32>
    %203 = arith.divf %201, %202 : vector<8x128xf32>
    %204 = math.tanh %198 : vector<8x128xf32>
    %205 = vector.extract_strided_slice %203 {offsets = [0, 0], sizes = [8, 32], strides = [1, 1]} : vector<8x128xf32> to vector<8x32xf32>
    %206 = vector.extract_strided_slice %203 {offsets = [0, 32], sizes = [8, 32], strides = [1, 1]} : vector<8x128xf32> to vector<8x32xf32>
    %207 = vector.extract_strided_slice %204 {offsets = [0, 64], sizes = [8, 32], strides = [1, 1]} : vector<8x128xf32> to vector<8x32xf32>
    %208 = vector.extract_strided_slice %203 {offsets = [0, 96], sizes = [8, 32], strides = [1, 1]} : vector<8x128xf32> to vector<8x32xf32>
    %209 = arith.mulf %206, %155 : vector<8x32xf32>
    %210 = arith.mulf %205, %207 : vector<8x32xf32>
    %211 = arith.addf %209, %210 : vector<8x32xf32>
    %212 = math.tanh %211 : vector<8x32xf32>
    %213 = arith.mulf %208, %212 : vector<8x32xf32>
    %214 = vector.extract_strided_slice %195 {offsets = [0, 128], sizes = [8, 128], strides = [1, 1]} : vector<8x384xf32> to vector<8x128xf32>
    %215 = arith.negf %214 : vector<8x128xf32>
    %216 = math.exp %215 : vector<8x128xf32>
    %cst_41 = arith.constant 1.000000e+00 : f32
    %217 = vector.broadcast %cst_41 : f32 to vector<8x128xf32>
    %218 = arith.addf %217, %216 : vector<8x128xf32>
    %219 = arith.divf %217, %218 : vector<8x128xf32>
    %220 = math.tanh %214 : vector<8x128xf32>
    %221 = vector.extract_strided_slice %219 {offsets = [0, 0], sizes = [8, 32], strides = [1, 1]} : vector<8x128xf32> to vector<8x32xf32>
    %222 = vector.extract_strided_slice %219 {offsets = [0, 32], sizes = [8, 32], strides = [1, 1]} : vector<8x128xf32> to vector<8x32xf32>
    %223 = vector.extract_strided_slice %220 {offsets = [0, 64], sizes = [8, 32], strides = [1, 1]} : vector<8x128xf32> to vector<8x32xf32>
    %224 = vector.extract_strided_slice %219 {offsets = [0, 96], sizes = [8, 32], strides = [1, 1]} : vector<8x128xf32> to vector<8x32xf32>
    %225 = arith.mulf %222, %171 : vector<8x32xf32>
    %226 = arith.mulf %221, %223 : vector<8x32xf32>
    %227 = arith.addf %225, %226 : vector<8x32xf32>
    %228 = math.tanh %227 : vector<8x32xf32>
    %229 = arith.mulf %224, %228 : vector<8x32xf32>
    %230 = vector.extract_strided_slice %195 {offsets = [0, 256], sizes = [8, 128], strides = [1, 1]} : vector<8x384xf32> to vector<8x128xf32>
    %231 = arith.negf %230 : vector<8x128xf32>
    %232 = math.exp %231 : vector<8x128xf32>
    %cst_42 = arith.constant 1.000000e+00 : f32
    %233 = vector.broadcast %cst_42 : f32 to vector<8x128xf32>
    %234 = arith.addf %233, %232 : vector<8x128xf32>
    %235 = arith.divf %233, %234 : vector<8x128xf32>
    %236 = math.tanh %230 : vector<8x128xf32>
    %237 = vector.extract_strided_slice %235 {offsets = [0, 0], sizes = [8, 32], strides = [1, 1]} : vector<8x128xf32> to vector<8x32xf32>
    %238 = vector.extract_strided_slice %235 {offsets = [0, 32], sizes = [8, 32], strides = [1, 1]} : vector<8x128xf32> to vector<8x32xf32>
    %239 = vector.extract_strided_slice %236 {offsets = [0, 64], sizes = [8, 32], strides = [1, 1]} : vector<8x128xf32> to vector<8x32xf32>
    %240 = vector.extract_strided_slice %235 {offsets = [0, 96], sizes = [8, 32], strides = [1, 1]} : vector<8x128xf32> to vector<8x32xf32>
    %241 = arith.mulf %238, %187 : vector<8x32xf32>
    %242 = arith.mulf %237, %239 : vector<8x32xf32>
    %243 = arith.addf %241, %242 : vector<8x32xf32>
    %244 = math.tanh %243 : vector<8x32xf32>
    %245 = arith.mulf %240, %244 : vector<8x32xf32>
    %c16 = arith.constant 16 : index
    %c0_43 = arith.constant 0 : index
    %246 = vector.load %arg11[%c16, %c0_43] : memref<64x32xf32, #tpu.memory_space<vmem>>, vector<8x32xf32>
    tpu.vector_store %arg11[%c16, %c0_43], %245 {strides = array<i32>} : memref<64x32xf32, #tpu.memory_space<vmem>>, vector<8x32xf32>,
    %247 = tpu.concatenate %213, %229, %245 in 1 : vector<8x32xf32>, vector<8x32xf32>, vector<8x32xf32> -> vector<8x96xf32>
    %248 = arith.truncf %247 : vector<8x96xf32> to vector<8x96xbf16>
    %cst_44 = arith.constant dense<0.000000e+00> : vector<8x384xf32>
    %249 = tpu.matmul %248, %3, %cst_44 {dimension_numbers = #tpu.dot_dimension_numbers<[1], [0], [0], [1], [0, 0, 1, 1], [], []>} : vector<8x96xbf16>, vector<96x384xbf16>, vector<8x384xf32> -> vector<8x384xf32>
    %250 = vector.broadcast %4 : vector<1x384xf32> to vector<8x384xf32>
    %251 = arith.addf %249, %250 : vector<8x384xf32>
    %252 = vector.extract_strided_slice %251 {offsets = [0, 0], sizes = [8, 128], strides = [1, 1]} : vector<8x384xf32> to vector<8x128xf32>
    %253 = vector.extract_strided_slice %2 {offsets = [40, 0], sizes = [8, 128], strides = [1, 1]} : vector<64x128xf32> to vector<8x128xf32>
    %254 = arith.addf %252, %253 : vector<8x128xf32>
    %255 = arith.negf %254 : vector<8x128xf32>
    %256 = math.exp %255 : vector<8x128xf32>
    %cst_45 = arith.constant 1.000000e+00 : f32
    %257 = vector.broadcast %cst_45 : f32 to vector<8x128xf32>
    %258 = arith.addf %257, %256 : vector<8x128xf32>
    %259 = arith.divf %257, %258 : vector<8x128xf32>
    %260 = math.tanh %254 : vector<8x128xf32>
    %261 = vector.extract_strided_slice %259 {offsets = [0, 0], sizes = [8, 32], strides = [1, 1]} : vector<8x128xf32> to vector<8x32xf32>
    %262 = vector.extract_strided_slice %259 {offsets = [0, 32], sizes = [8, 32], strides = [1, 1]} : vector<8x128xf32> to vector<8x32xf32>
    %263 = vector.extract_strided_slice %260 {offsets = [0, 64], sizes = [8, 32], strides = [1, 1]} : vector<8x128xf32> to vector<8x32xf32>
    %264 = vector.extract_strided_slice %259 {offsets = [0, 96], sizes = [8, 32], strides = [1, 1]} : vector<8x128xf32> to vector<8x32xf32>
    %265 = arith.mulf %262, %211 : vector<8x32xf32>
    %266 = arith.mulf %261, %263 : vector<8x32xf32>
    %267 = arith.addf %265, %266 : vector<8x32xf32>
    %268 = math.tanh %267 : vector<8x32xf32>
    %269 = arith.mulf %264, %268 : vector<8x32xf32>
    %270 = vector.extract_strided_slice %251 {offsets = [0, 128], sizes = [8, 128], strides = [1, 1]} : vector<8x384xf32> to vector<8x128xf32>
    %271 = arith.negf %270 : vector<8x128xf32>
    %272 = math.exp %271 : vector<8x128xf32>
    %cst_46 = arith.constant 1.000000e+00 : f32
    %273 = vector.broadcast %cst_46 : f32 to vector<8x128xf32>
    %274 = arith.addf %273, %272 : vector<8x128xf32>
    %275 = arith.divf %273, %274 : vector<8x128xf32>
    %276 = math.tanh %270 : vector<8x128xf32>
    %277 = vector.extract_strided_slice %275 {offsets = [0, 0], sizes = [8, 32], strides = [1, 1]} : vector<8x128xf32> to vector<8x32xf32>
    %278 = vector.extract_strided_slice %275 {offsets = [0, 32], sizes = [8, 32], strides = [1, 1]} : vector<8x128xf32> to vector<8x32xf32>
    %279 = vector.extract_strided_slice %276 {offsets = [0, 64], sizes = [8, 32], strides = [1, 1]} : vector<8x128xf32> to vector<8x32xf32>
    %280 = vector.extract_strided_slice %275 {offsets = [0, 96], sizes = [8, 32], strides = [1, 1]} : vector<8x128xf32> to vector<8x32xf32>
    %281 = arith.mulf %278, %227 : vector<8x32xf32>
    %282 = arith.mulf %277, %279 : vector<8x32xf32>
    %283 = arith.addf %281, %282 : vector<8x32xf32>
    %284 = math.tanh %283 : vector<8x32xf32>
    %285 = arith.mulf %280, %284 : vector<8x32xf32>
    %286 = vector.extract_strided_slice %251 {offsets = [0, 256], sizes = [8, 128], strides = [1, 1]} : vector<8x384xf32> to vector<8x128xf32>
    %287 = arith.negf %286 : vector<8x128xf32>
    %288 = math.exp %287 : vector<8x128xf32>
    %cst_47 = arith.constant 1.000000e+00 : f32
    %289 = vector.broadcast %cst_47 : f32 to vector<8x128xf32>
    %290 = arith.addf %289, %288 : vector<8x128xf32>
    %291 = arith.divf %289, %290 : vector<8x128xf32>
    %292 = math.tanh %286 : vector<8x128xf32>
    %293 = vector.extract_strided_slice %291 {offsets = [0, 0], sizes = [8, 32], strides = [1, 1]} : vector<8x128xf32> to vector<8x32xf32>
    %294 = vector.extract_strided_slice %291 {offsets = [0, 32], sizes = [8, 32], strides = [1, 1]} : vector<8x128xf32> to vector<8x32xf32>
    %295 = vector.extract_strided_slice %292 {offsets = [0, 64], sizes = [8, 32], strides = [1, 1]} : vector<8x128xf32> to vector<8x32xf32>
    %296 = vector.extract_strided_slice %291 {offsets = [0, 96], sizes = [8, 32], strides = [1, 1]} : vector<8x128xf32> to vector<8x32xf32>
    %297 = arith.mulf %294, %243 : vector<8x32xf32>
    %298 = arith.mulf %293, %295 : vector<8x32xf32>
    %299 = arith.addf %297, %298 : vector<8x32xf32>
    %300 = math.tanh %299 : vector<8x32xf32>
    %301 = arith.mulf %296, %300 : vector<8x32xf32>
    %c24 = arith.constant 24 : index
    %c0_48 = arith.constant 0 : index
    %302 = vector.load %arg11[%c24, %c0_48] : memref<64x32xf32, #tpu.memory_space<vmem>>, vector<8x32xf32>
    tpu.vector_store %arg11[%c24, %c0_48], %301 {strides = array<i32>} : memref<64x32xf32, #tpu.memory_space<vmem>>, vector<8x32xf32>,
    %303 = tpu.concatenate %269, %285, %301 in 1 : vector<8x32xf32>, vector<8x32xf32>, vector<8x32xf32> -> vector<8x96xf32>
    %304 = arith.truncf %303 : vector<8x96xf32> to vector<8x96xbf16>
    %cst_49 = arith.constant dense<0.000000e+00> : vector<8x384xf32>
    %305 = tpu.matmul %304, %3, %cst_49 {dimension_numbers = #tpu.dot_dimension_numbers<[1], [0], [0], [1], [0, 0, 1, 1], [], []>} : vector<8x96xbf16>, vector<96x384xbf16>, vector<8x384xf32> -> vector<8x384xf32>
    %306 = vector.broadcast %4 : vector<1x384xf32> to vector<8x384xf32>
    %307 = arith.addf %305, %306 : vector<8x384xf32>
    %308 = vector.extract_strided_slice %307 {offsets = [0, 0], sizes = [8, 128], strides = [1, 1]} : vector<8x384xf32> to vector<8x128xf32>
    %309 = vector.extract_strided_slice %2 {offsets = [48, 0], sizes = [8, 128], strides = [1, 1]} : vector<64x128xf32> to vector<8x128xf32>
    %310 = arith.addf %308, %309 : vector<8x128xf32>
    %311 = arith.negf %310 : vector<8x128xf32>
    %312 = math.exp %311 : vector<8x128xf32>
    %cst_50 = arith.constant 1.000000e+00 : f32
    %313 = vector.broadcast %cst_50 : f32 to vector<8x128xf32>
    %314 = arith.addf %313, %312 : vector<8x128xf32>
    %315 = arith.divf %313, %314 : vector<8x128xf32>
    %316 = math.tanh %310 : vector<8x128xf32>
    %317 = vector.extract_strided_slice %315 {offsets = [0, 0], sizes = [8, 32], strides = [1, 1]} : vector<8x128xf32> to vector<8x32xf32>
    %318 = vector.extract_strided_slice %315 {offsets = [0, 32], sizes = [8, 32], strides = [1, 1]} : vector<8x128xf32> to vector<8x32xf32>
    %319 = vector.extract_strided_slice %316 {offsets = [0, 64], sizes = [8, 32], strides = [1, 1]} : vector<8x128xf32> to vector<8x32xf32>
    %320 = vector.extract_strided_slice %315 {offsets = [0, 96], sizes = [8, 32], strides = [1, 1]} : vector<8x128xf32> to vector<8x32xf32>
    %321 = arith.mulf %318, %267 : vector<8x32xf32>
    %322 = arith.mulf %317, %319 : vector<8x32xf32>
    %323 = arith.addf %321, %322 : vector<8x32xf32>
    %324 = math.tanh %323 : vector<8x32xf32>
    %325 = arith.mulf %320, %324 : vector<8x32xf32>
    %326 = vector.extract_strided_slice %307 {offsets = [0, 128], sizes = [8, 128], strides = [1, 1]} : vector<8x384xf32> to vector<8x128xf32>
    %327 = arith.negf %326 : vector<8x128xf32>
    %328 = math.exp %327 : vector<8x128xf32>
    %cst_51 = arith.constant 1.000000e+00 : f32
    %329 = vector.broadcast %cst_51 : f32 to vector<8x128xf32>
    %330 = arith.addf %329, %328 : vector<8x128xf32>
    %331 = arith.divf %329, %330 : vector<8x128xf32>
    %332 = math.tanh %326 : vector<8x128xf32>
    %333 = vector.extract_strided_slice %331 {offsets = [0, 0], sizes = [8, 32], strides = [1, 1]} : vector<8x128xf32> to vector<8x32xf32>
    %334 = vector.extract_strided_slice %331 {offsets = [0, 32], sizes = [8, 32], strides = [1, 1]} : vector<8x128xf32> to vector<8x32xf32>
    %335 = vector.extract_strided_slice %332 {offsets = [0, 64], sizes = [8, 32], strides = [1, 1]} : vector<8x128xf32> to vector<8x32xf32>
    %336 = vector.extract_strided_slice %331 {offsets = [0, 96], sizes = [8, 32], strides = [1, 1]} : vector<8x128xf32> to vector<8x32xf32>
    %337 = arith.mulf %334, %283 : vector<8x32xf32>
    %338 = arith.mulf %333, %335 : vector<8x32xf32>
    %339 = arith.addf %337, %338 : vector<8x32xf32>
    %340 = math.tanh %339 : vector<8x32xf32>
    %341 = arith.mulf %336, %340 : vector<8x32xf32>
    %342 = vector.extract_strided_slice %307 {offsets = [0, 256], sizes = [8, 128], strides = [1, 1]} : vector<8x384xf32> to vector<8x128xf32>
    %343 = arith.negf %342 : vector<8x128xf32>
    %344 = math.exp %343 : vector<8x128xf32>
    %cst_52 = arith.constant 1.000000e+00 : f32
    %345 = vector.broadcast %cst_52 : f32 to vector<8x128xf32>
    %346 = arith.addf %345, %344 : vector<8x128xf32>
    %347 = arith.divf %345, %346 : vector<8x128xf32>
    %348 = math.tanh %342 : vector<8x128xf32>
    %349 = vector.extract_strided_slice %347 {offsets = [0, 0], sizes = [8, 32], strides = [1, 1]} : vector<8x128xf32> to vector<8x32xf32>
    %350 = vector.extract_strided_slice %347 {offsets = [0, 32], sizes = [8, 32], strides = [1, 1]} : vector<8x128xf32> to vector<8x32xf32>
    %351 = vector.extract_strided_slice %348 {offsets = [0, 64], sizes = [8, 32], strides = [1, 1]} : vector<8x128xf32> to vector<8x32xf32>
    %352 = vector.extract_strided_slice %347 {offsets = [0, 96], sizes = [8, 32], strides = [1, 1]} : vector<8x128xf32> to vector<8x32xf32>
    %353 = arith.mulf %350, %299 : vector<8x32xf32>
    %354 = arith.mulf %349, %351 : vector<8x32xf32>
    %355 = arith.addf %353, %354 : vector<8x32xf32>
    %356 = math.tanh %355 : vector<8x32xf32>
    %357 = arith.mulf %352, %356 : vector<8x32xf32>
    %c32 = arith.constant 32 : index
    %c0_53 = arith.constant 0 : index
    %358 = vector.load %arg11[%c32, %c0_53] : memref<64x32xf32, #tpu.memory_space<vmem>>, vector<8x32xf32>
    tpu.vector_store %arg11[%c32, %c0_53], %357 {strides = array<i32>} : memref<64x32xf32, #tpu.memory_space<vmem>>, vector<8x32xf32>,
    %359 = tpu.concatenate %325, %341, %357 in 1 : vector<8x32xf32>, vector<8x32xf32>, vector<8x32xf32> -> vector<8x96xf32>
    %360 = arith.truncf %359 : vector<8x96xf32> to vector<8x96xbf16>
    %cst_54 = arith.constant dense<0.000000e+00> : vector<8x384xf32>
    %361 = tpu.matmul %360, %3, %cst_54 {dimension_numbers = #tpu.dot_dimension_numbers<[1], [0], [0], [1], [0, 0, 1, 1], [], []>} : vector<8x96xbf16>, vector<96x384xbf16>, vector<8x384xf32> -> vector<8x384xf32>
    %362 = vector.broadcast %4 : vector<1x384xf32> to vector<8x384xf32>
    %363 = arith.addf %361, %362 : vector<8x384xf32>
    %364 = vector.extract_strided_slice %363 {offsets = [0, 0], sizes = [8, 128], strides = [1, 1]} : vector<8x384xf32> to vector<8x128xf32>
    %365 = vector.extract_strided_slice %2 {offsets = [56, 0], sizes = [8, 128], strides = [1, 1]} : vector<64x128xf32> to vector<8x128xf32>
    %366 = arith.addf %364, %365 : vector<8x128xf32>
    %367 = arith.negf %366 : vector<8x128xf32>
    %368 = math.exp %367 : vector<8x128xf32>
    %cst_55 = arith.constant 1.000000e+00 : f32
    %369 = vector.broadcast %cst_55 : f32 to vector<8x128xf32>
    %370 = arith.addf %369, %368 : vector<8x128xf32>
    %371 = arith.divf %369, %370 : vector<8x128xf32>
    %372 = math.tanh %366 : vector<8x128xf32>
    %373 = vector.extract_strided_slice %371 {offsets = [0, 0], sizes = [8, 32], strides = [1, 1]} : vector<8x128xf32> to vector<8x32xf32>
    %374 = vector.extract_strided_slice %371 {offsets = [0, 32], sizes = [8, 32], strides = [1, 1]} : vector<8x128xf32> to vector<8x32xf32>
    %375 = vector.extract_strided_slice %372 {offsets = [0, 64], sizes = [8, 32], strides = [1, 1]} : vector<8x128xf32> to vector<8x32xf32>
    %376 = vector.extract_strided_slice %371 {offsets = [0, 96], sizes = [8, 32], strides = [1, 1]} : vector<8x128xf32> to vector<8x32xf32>
    %377 = arith.mulf %374, %323 : vector<8x32xf32>
    %378 = arith.mulf %373, %375 : vector<8x32xf32>
    %379 = arith.addf %377, %378 : vector<8x32xf32>
    %380 = math.tanh %379 : vector<8x32xf32>
    %381 = arith.mulf %376, %380 : vector<8x32xf32>
    %382 = vector.extract_strided_slice %363 {offsets = [0, 128], sizes = [8, 128], strides = [1, 1]} : vector<8x384xf32> to vector<8x128xf32>
    %383 = arith.negf %382 : vector<8x128xf32>
    %384 = math.exp %383 : vector<8x128xf32>
    %cst_56 = arith.constant 1.000000e+00 : f32
    %385 = vector.broadcast %cst_56 : f32 to vector<8x128xf32>
    %386 = arith.addf %385, %384 : vector<8x128xf32>
    %387 = arith.divf %385, %386 : vector<8x128xf32>
    %388 = math.tanh %382 : vector<8x128xf32>
    %389 = vector.extract_strided_slice %387 {offsets = [0, 0], sizes = [8, 32], strides = [1, 1]} : vector<8x128xf32> to vector<8x32xf32>
    %390 = vector.extract_strided_slice %387 {offsets = [0, 32], sizes = [8, 32], strides = [1, 1]} : vector<8x128xf32> to vector<8x32xf32>
    %391 = vector.extract_strided_slice %388 {offsets = [0, 64], sizes = [8, 32], strides = [1, 1]} : vector<8x128xf32> to vector<8x32xf32>
    %392 = vector.extract_strided_slice %387 {offsets = [0, 96], sizes = [8, 32], strides = [1, 1]} : vector<8x128xf32> to vector<8x32xf32>
    %393 = arith.mulf %390, %339 : vector<8x32xf32>
    %394 = arith.mulf %389, %391 : vector<8x32xf32>
    %395 = arith.addf %393, %394 : vector<8x32xf32>
    %396 = math.tanh %395 : vector<8x32xf32>
    %397 = arith.mulf %392, %396 : vector<8x32xf32>
    %398 = vector.extract_strided_slice %363 {offsets = [0, 256], sizes = [8, 128], strides = [1, 1]} : vector<8x384xf32> to vector<8x128xf32>
    %399 = arith.negf %398 : vector<8x128xf32>
    %400 = math.exp %399 : vector<8x128xf32>
    %cst_57 = arith.constant 1.000000e+00 : f32
    %401 = vector.broadcast %cst_57 : f32 to vector<8x128xf32>
    %402 = arith.addf %401, %400 : vector<8x128xf32>
    %403 = arith.divf %401, %402 : vector<8x128xf32>
    %404 = math.tanh %398 : vector<8x128xf32>
    %405 = vector.extract_strided_slice %403 {offsets = [0, 0], sizes = [8, 32], strides = [1, 1]} : vector<8x128xf32> to vector<8x32xf32>
    %406 = vector.extract_strided_slice %403 {offsets = [0, 32], sizes = [8, 32], strides = [1, 1]} : vector<8x128xf32> to vector<8x32xf32>
    %407 = vector.extract_strided_slice %404 {offsets = [0, 64], sizes = [8, 32], strides = [1, 1]} : vector<8x128xf32> to vector<8x32xf32>
    %408 = vector.extract_strided_slice %403 {offsets = [0, 96], sizes = [8, 32], strides = [1, 1]} : vector<8x128xf32> to vector<8x32xf32>
    %409 = arith.mulf %406, %355 : vector<8x32xf32>
    %410 = arith.mulf %405, %407 : vector<8x32xf32>
    %411 = arith.addf %409, %410 : vector<8x32xf32>
    %412 = math.tanh %411 : vector<8x32xf32>
    %413 = arith.mulf %408, %412 : vector<8x32xf32>
    %c40 = arith.constant 40 : index
    %c0_58 = arith.constant 0 : index
    %414 = vector.load %arg11[%c40, %c0_58] : memref<64x32xf32, #tpu.memory_space<vmem>>, vector<8x32xf32>
    tpu.vector_store %arg11[%c40, %c0_58], %413 {strides = array<i32>} : memref<64x32xf32, #tpu.memory_space<vmem>>, vector<8x32xf32>,
    %415 = tpu.concatenate %381, %397, %413 in 1 : vector<8x32xf32>, vector<8x32xf32>, vector<8x32xf32> -> vector<8x96xf32>
    %416 = arith.truncf %415 : vector<8x96xf32> to vector<8x96xbf16>
    %cst_59 = arith.constant dense<0.000000e+00> : vector<8x384xf32>
    %417 = tpu.matmul %416, %3, %cst_59 {dimension_numbers = #tpu.dot_dimension_numbers<[1], [0], [0], [1], [0, 0, 1, 1], [], []>} : vector<8x96xbf16>, vector<96x384xbf16>, vector<8x384xf32> -> vector<8x384xf32>
    %418 = vector.broadcast %4 : vector<1x384xf32> to vector<8x384xf32>
    %419 = arith.addf %417, %418 : vector<8x384xf32>
    %420 = vector.extract_strided_slice %419 {offsets = [0, 128], sizes = [8, 128], strides = [1, 1]} : vector<8x384xf32> to vector<8x128xf32>
    %421 = arith.negf %420 : vector<8x128xf32>
    %422 = math.exp %421 : vector<8x128xf32>
    %cst_60 = arith.constant 1.000000e+00 : f32
    %423 = vector.broadcast %cst_60 : f32 to vector<8x128xf32>
    %424 = arith.addf %423, %422 : vector<8x128xf32>
    %425 = arith.divf %423, %424 : vector<8x128xf32>
    %426 = math.tanh %420 : vector<8x128xf32>
    %427 = vector.extract_strided_slice %425 {offsets = [0, 0], sizes = [8, 32], strides = [1, 1]} : vector<8x128xf32> to vector<8x32xf32>
    %428 = vector.extract_strided_slice %425 {offsets = [0, 32], sizes = [8, 32], strides = [1, 1]} : vector<8x128xf32> to vector<8x32xf32>
    %429 = vector.extract_strided_slice %426 {offsets = [0, 64], sizes = [8, 32], strides = [1, 1]} : vector<8x128xf32> to vector<8x32xf32>
    %430 = vector.extract_strided_slice %425 {offsets = [0, 96], sizes = [8, 32], strides = [1, 1]} : vector<8x128xf32> to vector<8x32xf32>
    %431 = arith.mulf %428, %395 : vector<8x32xf32>
    %432 = arith.mulf %427, %429 : vector<8x32xf32>
    %433 = arith.addf %431, %432 : vector<8x32xf32>
    %434 = math.tanh %433 : vector<8x32xf32>
    %435 = arith.mulf %430, %434 : vector<8x32xf32>
    %436 = vector.extract_strided_slice %419 {offsets = [0, 256], sizes = [8, 128], strides = [1, 1]} : vector<8x384xf32> to vector<8x128xf32>
    %437 = arith.negf %436 : vector<8x128xf32>
    %438 = math.exp %437 : vector<8x128xf32>
    %cst_61 = arith.constant 1.000000e+00 : f32
    %439 = vector.broadcast %cst_61 : f32 to vector<8x128xf32>
    %440 = arith.addf %439, %438 : vector<8x128xf32>
    %441 = arith.divf %439, %440 : vector<8x128xf32>
    %442 = math.tanh %436 : vector<8x128xf32>
    %443 = vector.extract_strided_slice %441 {offsets = [0, 0], sizes = [8, 32], strides = [1, 1]} : vector<8x128xf32> to vector<8x32xf32>
    %444 = vector.extract_strided_slice %441 {offsets = [0, 32], sizes = [8, 32], strides = [1, 1]} : vector<8x128xf32> to vector<8x32xf32>
    %445 = vector.extract_strided_slice %442 {offsets = [0, 64], sizes = [8, 32], strides = [1, 1]} : vector<8x128xf32> to vector<8x32xf32>
    %446 = vector.extract_strided_slice %441 {offsets = [0, 96], sizes = [8, 32], strides = [1, 1]} : vector<8x128xf32> to vector<8x32xf32>
    %447 = arith.mulf %444, %411 : vector<8x32xf32>
    %448 = arith.mulf %443, %445 : vector<8x32xf32>
    %449 = arith.addf %447, %448 : vector<8x32xf32>
    %450 = math.tanh %449 : vector<8x32xf32>
    %451 = arith.mulf %446, %450 : vector<8x32xf32>
    %c48 = arith.constant 48 : index
    %c0_62 = arith.constant 0 : index
    %452 = vector.load %arg11[%c48, %c0_62] : memref<64x32xf32, #tpu.memory_space<vmem>>, vector<8x32xf32>
    tpu.vector_store %arg11[%c48, %c0_62], %451 {strides = array<i32>} : memref<64x32xf32, #tpu.memory_space<vmem>>, vector<8x32xf32>,
    %453 = tpu.concatenate %381, %435, %451 in 1 : vector<8x32xf32>, vector<8x32xf32>, vector<8x32xf32> -> vector<8x96xf32>
    %454 = arith.truncf %453 : vector<8x96xf32> to vector<8x96xbf16>
    %cst_63 = arith.constant dense<0.000000e+00> : vector<8x384xf32>
    %455 = tpu.matmul %454, %3, %cst_63 {dimension_numbers = #tpu.dot_dimension_numbers<[1], [0], [0], [1], [0, 0, 1, 1], [], []>} : vector<8x96xbf16>, vector<96x384xbf16>, vector<8x384xf32> -> vector<8x384xf32>
    %456 = vector.broadcast %4 : vector<1x384xf32> to vector<8x384xf32>
    %457 = arith.addf %455, %456 : vector<8x384xf32>
    %458 = vector.extract_strided_slice %457 {offsets = [0, 256], sizes = [8, 128], strides = [1, 1]} : vector<8x384xf32> to vector<8x128xf32>
    %459 = arith.negf %458 : vector<8x128xf32>
    %460 = math.exp %459 : vector<8x128xf32>
    %cst_64 = arith.constant 1.000000e+00 : f32
    %461 = vector.broadcast %cst_64 : f32 to vector<8x128xf32>
    %462 = arith.addf %461, %460 : vector<8x128xf32>
    %463 = arith.divf %461, %462 : vector<8x128xf32>
    %464 = math.tanh %458 : vector<8x128xf32>
    %465 = vector.extract_strided_slice %463 {offsets = [0, 0], sizes = [8, 32], strides = [1, 1]} : vector<8x128xf32> to vector<8x32xf32>
    %466 = vector.extract_strided_slice %463 {offsets = [0, 32], sizes = [8, 32], strides = [1, 1]} : vector<8x128xf32> to vector<8x32xf32>
    %467 = vector.extract_strided_slice %464 {offsets = [0, 64], sizes = [8, 32], strides = [1, 1]} : vector<8x128xf32> to vector<8x32xf32>
    %468 = vector.extract_strided_slice %463 {offsets = [0, 96], sizes = [8, 32], strides = [1, 1]} : vector<8x128xf32> to vector<8x32xf32>
    %469 = arith.mulf %466, %449 : vector<8x32xf32>
    %470 = arith.mulf %465, %467 : vector<8x32xf32>
    %471 = arith.addf %469, %470 : vector<8x32xf32>
    %472 = math.tanh %471 : vector<8x32xf32>
    %473 = arith.mulf %468, %472 : vector<8x32xf32>
    %c56 = arith.constant 56 : index
    %c0_65 = arith.constant 0 : index
    %474 = vector.load %arg11[%c56, %c0_65] : memref<64x32xf32, #tpu.memory_space<vmem>>, vector<8x32xf32>
    tpu.vector_store %arg11[%c56, %c0_65], %473 {strides = array<i32>} : memref<64x32xf32, #tpu.memory_space<vmem>>, vector<8x32xf32>,
    %c0_66 = arith.constant 0 : index
    %c0_67 = arith.constant 0 : index
    %c0_68 = arith.constant 0 : index
    %475 = vector.load %arg9[%c0_66, %c0_67, %c0_68] : memref<3x8x32xf32, #tpu.memory_space<vmem>>, vector<1x8x32xf32>
    %476 = vector.shape_cast %475 : vector<1x8x32xf32> to vector<8x32xf32>
    %477 = vector.shape_cast %381 : vector<8x32xf32> to vector<1x8x32xf32>
    tpu.vector_store %arg9[%c0_66, %c0_67, %c0_68], %477 {strides = array<i32>} : memref<3x8x32xf32, #tpu.memory_space<vmem>>, vector<1x8x32xf32>,
    %c0_69 = arith.constant 0 : index
    %c0_70 = arith.constant 0 : index
    %c0_71 = arith.constant 0 : index
    %478 = vector.load %arg10[%c0_69, %c0_70, %c0_71] : memref<3x8x32xf32, #tpu.memory_space<vmem>>, vector<1x8x32xf32>
    %479 = vector.shape_cast %478 : vector<1x8x32xf32> to vector<8x32xf32>
    %480 = vector.shape_cast %379 : vector<8x32xf32> to vector<1x8x32xf32>
    tpu.vector_store %arg10[%c0_69, %c0_70, %c0_71], %480 {strides = array<i32>} : memref<3x8x32xf32, #tpu.memory_space<vmem>>, vector<1x8x32xf32>,
    %c1_72 = arith.constant 1 : index
    %c0_73 = arith.constant 0 : index
    %c0_74 = arith.constant 0 : index
    %481 = vector.load %arg9[%c1_72, %c0_73, %c0_74] : memref<3x8x32xf32, #tpu.memory_space<vmem>>, vector<1x8x32xf32>
    %482 = vector.shape_cast %481 : vector<1x8x32xf32> to vector<8x32xf32>
    %483 = vector.shape_cast %435 : vector<8x32xf32> to vector<1x8x32xf32>
    tpu.vector_store %arg9[%c1_72, %c0_73, %c0_74], %483 {strides = array<i32>} : memref<3x8x32xf32, #tpu.memory_space<vmem>>, vector<1x8x32xf32>,
    %c1_75 = arith.constant 1 : index
    %c0_76 = arith.constant 0 : index
    %c0_77 = arith.constant 0 : index
    %484 = vector.load %arg10[%c1_75, %c0_76, %c0_77] : memref<3x8x32xf32, #tpu.memory_space<vmem>>, vector<1x8x32xf32>
    %485 = vector.shape_cast %484 : vector<1x8x32xf32> to vector<8x32xf32>
    %486 = vector.shape_cast %433 : vector<8x32xf32> to vector<1x8x32xf32>
    tpu.vector_store %arg10[%c1_75, %c0_76, %c0_77], %486 {strides = array<i32>} : memref<3x8x32xf32, #tpu.memory_space<vmem>>, vector<1x8x32xf32>,
    %c2_78 = arith.constant 2 : index
    %c0_79 = arith.constant 0 : index
    %c0_80 = arith.constant 0 : index
    %487 = vector.load %arg9[%c2_78, %c0_79, %c0_80] : memref<3x8x32xf32, #tpu.memory_space<vmem>>, vector<1x8x32xf32>
    %488 = vector.shape_cast %487 : vector<1x8x32xf32> to vector<8x32xf32>
    %489 = vector.shape_cast %473 : vector<8x32xf32> to vector<1x8x32xf32>
    tpu.vector_store %arg9[%c2_78, %c0_79, %c0_80], %489 {strides = array<i32>} : memref<3x8x32xf32, #tpu.memory_space<vmem>>, vector<1x8x32xf32>,
    %c2_81 = arith.constant 2 : index
    %c0_82 = arith.constant 0 : index
    %c0_83 = arith.constant 0 : index
    %490 = vector.load %arg10[%c2_81, %c0_82, %c0_83] : memref<3x8x32xf32, #tpu.memory_space<vmem>>, vector<1x8x32xf32>
    %491 = vector.shape_cast %490 : vector<1x8x32xf32> to vector<8x32xf32>
    %492 = vector.shape_cast %471 : vector<8x32xf32> to vector<1x8x32xf32>
    tpu.vector_store %arg10[%c2_81, %c0_82, %c0_83], %492 {strides = array<i32>} : memref<3x8x32xf32, #tpu.memory_space<vmem>>, vector<1x8x32xf32>,
    %c0_84 = arith.constant 0 : index
    %c0_85 = arith.constant 0 : index
    %493 = vector.load %arg11[%c0_84, %c0_85] : memref<64x32xf32, #tpu.memory_space<vmem>>, vector<64x32xf32>
    %c0_86 = arith.constant 0 : index
    %c0_87 = arith.constant 0 : index
    %494 = vector.load %arg6[%c0_86, %c0_87] : memref<32x16xf32, #tpu.memory_space<vmem>>, vector<32x16xf32>
    %cst_88 = arith.constant dense<0.000000e+00> : vector<64x16xf32>
    %495 = tpu.matmul %493, %494, %cst_88 {dimension_numbers = #tpu.dot_dimension_numbers<[1], [0], [0], [1], [0, 0, 1, 1], [], []>} : vector<64x32xf32>, vector<32x16xf32>, vector<64x16xf32> -> vector<64x16xf32>
    %c0_89 = arith.constant 0 : index
    %c0_90 = arith.constant 0 : index
    %496 = vector.load %arg7[%c0_89, %c0_90] : memref<1x16xf32, #tpu.memory_space<vmem>>, vector<1x16xf32>
    %497 = vector.broadcast %496 : vector<1x16xf32> to vector<64x16xf32>
    %498 = arith.addf %495, %497 : vector<64x16xf32>
    %c0_91 = arith.constant 0 : index
    %c0_92 = arith.constant 0 : index
    %499 = vector.load %arg8[%c0_91, %c0_92] : memref<64x16xf32, #tpu.memory_space<vmem>>, vector<64x16xf32>
    tpu.vector_store %arg8[%c0_91, %c0_92], %498 {strides = array<i32>} : memref<64x16xf32, #tpu.memory_space<vmem>>, vector<64x16xf32>,
    return
  }
}

</mosaic_0001>

<bundles_post_ra>
// kernel: music_rnn_forward.1
= control target key start
LH: loop header
LB: loop body
LE: loop exit
PB: predicated region body
PF: predicated region fallthrough
CT: control target
= control target key end

     0   :  { %v2558_v2 = vmov 0   ;;  %s2559_s17 = smov 32   ;;  %s2560_s26 = smov 64   ;;  %vm43_vm0 = vcmask 130048   ;;  %vm216_vm1 = vcmask 261120   ;;  %vm218_vm2 = vcmask 523264   ;;  %s3507_s1 = inlined_call_operand.vmem [shape: f32[3,8,32], index: 1, kind: input, shape index: {}]   ;;  %s3508_s4 = inlined_call_operand.vmem [shape: bf16[96,384], index: 4, kind: input, shape index: {}]   ;;  %s3509_s3 = inlined_call_operand.vmem [shape: f32[16,128], index: 3, kind: input, shape index: {}]   ;;  %s3510_s0 = inlined_call_operand.vmem [shape: f32[64,16], index: 0, kind: input, shape index: {}]   ;;  %s3511_s5 = inlined_call_operand.vmem [shape: f32[1,384], index: 5, kind: input, shape index: {}]   ;;  %s3512_s2 = inlined_call_operand.vmem [shape: f32[3,8,32], index: 2, kind: input, shape index: {}]   ;;  %s3513_s9 = inlined_call_operand.vmem [shape: f32[3,8,32], index: 9, kind: output, shape index: {1}]   ;;  %s3514_s6 = inlined_call_operand.vmem [shape: f32[32,16], index: 6, kind: input, shape index: {}]   ;;  %s3515_s10 = inlined_call_operand.vmem [shape: f32[3,8,32], index: 10, kind: output, shape index: {2}]   ;;  %s3516_s7 = inlined_call_operand.vmem [shape: f32[1,16], index: 7, kind: input, shape index: {}]   ;;  %s3517_s8 = inlined_call_operand.vmem [shape: f32[64,16], index: 8, kind: output, shape index: {0}]  }
   0x1   :  { %v2000_v0 = vld [vmem:[%s3507_s1 + $0x8] sm:$0xff]  ;;  %v2001_v1 = vld [vmem:[%s3507_s1 + $0x10] sm:$0xff]  ;;  %333 = vmatprep.mubr.bf16.mxu1 %v2558_v2  ;;  %v2635_v4 = vld [vmem:[%s3508_s4 + $0x78] ss:$12 sps:$4 sm:$0xff]   ;;  %vm297_vm3 = vcmask 785408   ;;  %v222_v25 = vlaneseq  ;;  %vm2562_vm4 = vmmov 0  }
   0x2   :  { %209 = vrot.lane.b32.xlu0 %v2000_v0, %s2559_s17  ;;  %v2630_v3 = vld [vmem:[%s3508_s4 + $0x7c] ss:$12 sps:$4 sm:$0xff]   ;;  %v2641_v5 = vld [vmem:[%s3508_s4 + $0x64] ss:$12 sps:$4 sm:$0xff]   ;;  %v2647_v6 = vld [vmem:[%s3508_s4 + $0x60] ss:$12 sps:$4 sm:$0xff]  }
   0x3   :  { %305 = vmatprep.subr.bf16.mxu1 %v2630_v3  ;;  %v2654_v7 = vld [vmem:[%s3508_s4 + $0x4c] ss:$12 sps:$4 sm:$0xff]   ;;  %v2659_v8 = vld [vmem:[%s3508_s4 + $0x48] ss:$12 sps:$4 sm:$0xff]   ;;  %v41_v10 = vld [vmem:[%s3509_s3] sm:$0xff]  ;;  %v2752_v26 = vshrl.u32 %v222_v25, 7 }
   0x4   :  { %306 = vmatpush1.bf16.msra.mxu1 %v2635_v4  ;;  %v42_v9 = vld [vmem:[%s3509_s3 + $0x8] sm:$0xff]  ;;  %v2672_v11 = vld [vmem:[%s3508_s4 + $0x34] ss:$12 sps:$4 sm:$0xff]   ;;  %v2680_v13 = vld [vmem:[%s3508_s4 + $0x30] ss:$12 sps:$4 sm:$0xff]  }
   0x5   :  { %307 = vmatprep.subr.bf16.mxu1 %v2641_v5  ;;  %2154 = vmatprep.subr.mxu0 %v42_v9  ;;  %v33_v12 = vld [vmem:[%s3510_s0] sm:$0xff]  ;;  %v34_v14 = vld [vmem:[%s3510_s0 + $0x8] sm:$0xff]  ;;  %v224_v27 = vsub.s32 0, %v2752_v26  ;;  %v35_v50 = vld [vmem:[%s3510_s0 + $0x10] sm:$0xff] }
   0x6   :  { %213 = vrot.lane.b32.xlu0 %v2001_v1, %s2560_s26  ;;  %2155 = vmatpush3.msra.mxu0 %v42_v9  ;;  %v2689_v15 = vld [vmem:[%s3508_s4 + $0x1c] ss:$12 sps:$4 sm:$0xff]   ;;  %v2701_v16 = vld [vmem:[%s3508_s4 + $0x18] ss:$12 sps:$4 sm:$0xff]   ;;  %v2715_v18 = vld [vmem:[%s3508_s4] ss:$12 sps:$4 sm:$0xff]  }
   0x7   :  { %2156 = vmatprep.subr.mxu0 %v41_v10  ;;  %2158 = vmatprep.mubr.msk.f32.mxu0 %vm43_vm0, %v33_v12  ;;  %v2707_v17 = vld [vmem:[%s3508_s4 + $0x4] ss:$12 sps:$4 sm:$0xff]   ;;  %v2758_v28 = vld [vmem:[%s3511_s5] sm:$0x7]  ;;  %v36_v51 = vld [vmem:[%s3510_s0 + $0x18] sm:$0xff]  ;;  %v228_v12 = vsub.s32 1, %v2752_v26 }
   0x8   :  { %308 = vmatpush1.bf16.msra.mxu1 %v2647_v6  ;;  %2157 = vmatpush3.msra.mxu0 %v41_v10  ;;  %v198_v20 = vld [vmem:[%s3507_s1] sm:$0xff]  ;;  %v2761_v29 = vrot.slane %v2758_v28, %v224_v27  ;;  %v38_v53 = vld [vmem:[%s3510_s0 + $0x28] sm:$0xff]  ;;  %v39_v54 = vld [vmem:[%s3510_s0 + $0x30] sm:$0xff] }
   0x9   :  { %309 = vmatprep.subr.bf16.mxu1 %v2654_v7  ;;  %2159 = vmatmul.mubr.msk.f32.vlgmr.msra.gmra.mxu0 %vm43_vm0, %v34_v14  ;;  %v203_v39 = vld [vmem:[%s3512_s2] sm:$0xff]  ;;  %v40_v55 = vld [vmem:[%s3510_s0 + $0x38] sm:$0xff] }
   0xa   :  { %384 = vmatprep.subr.bf16.mxu0 %v2630_v3  ;;  %v37_v52 = vld [vmem:[%s3510_s0 + $0x20] sm:$0xff]  ;;  %2161 = vmatprep.mubr.msk.f32.mxu0 %vm43_vm0, %v35_v50 }
   0xb   :  { %385 = vmatpush1.bf16.msra.mxu0 %v2635_v4 }
   0xc   :  { %310 = vmatpush1.bf16.msra.mxu1 %v2659_v8  ;;  %386 = vmatprep.subr.bf16.mxu0 %v2641_v5 }
   0xd   :  { %311 = vmatprep.subr.bf16.mxu1 %v2672_v11  ;;  %2162 = vmatmul.mubr.msk.f32.gmra.mxu0 %vm43_vm0, %v36_v51 }
   0xe   :  { %2164 = vmatprep.mubr.msk.f32.mxu0 %vm43_vm0, %v37_v52 }
   0xf   :  { %387 = vmatpush1.bf16.msra.mxu0 %v2647_v6 }
  0x10   :  { %312 = vmatpush1.bf16.msra.mxu1 %v2680_v13  ;;  %388 = vmatprep.subr.bf16.mxu0 %v2654_v7 }
  0x11   :  { %313 = vmatprep.subr.bf16.mxu1 %v2689_v15  ;;  %2165 = vmatmul.mubr.msk.f32.gmra.mxu0 %vm43_vm0, %v38_v53 }
  0x12   :  { %2167 = vmatprep.mubr.msk.f32.mxu0 %vm43_vm0, %v39_v54  ;;  %v2841_v54 = vld [vmem:[%s3508_s4 + $0x80] ss:$12 sps:$4 sm:$0xff]  }
  0x13   :  { %389 = vmatpush1.bf16.msra.mxu0 %v2659_v8 }
  0x14   :  { %314 = vmatpush1.bf16.msra.mxu1 %v2701_v16  ;;  %390 = vmatprep.subr.bf16.mxu0 %v2672_v11 }
  0x15   :  { %315 = vmatprep.subr.bf16.mxu1 %v2707_v17  ;;  %2168 = vmatmul.mubr.msk.f32.gmra.mxu0 %vm43_vm0, %v40_v55  ;;  %v2561_v55 = vmov 0.0  }
  0x16   :  { %412 = vmatprep.mubr.bf16.mxu0 %v2558_v2 }
  0x17   :  { %391 = vmatpush1.bf16.msra.mxu0 %v2680_v13 }
  0x18   :  { %316 = vmatpush1.bf16.msra.mxu1 %v2715_v18  ;;  %392 = vmatprep.subr.bf16.mxu0 %v2689_v15 }
  0x19   :  { %528 = vmatprep.subr.bf16.mxu1 %v2630_v3 }
  0x1b   :  { %393 = vmatpush1.bf16.msra.mxu0 %v2701_v16 }
  0x1c   :  { %394 = vmatprep.subr.bf16.mxu0 %v2707_v17 }
  0x1f   :  { %395 = vmatpush1.bf16.msra.mxu0 %v2715_v18 }
  0x20   :  { %2170 = vmatprep.subr.bf16.mxu0 %v2561_v55 }
  0x74   :  { %v2727_v19 = vpop.permute.xlu0 %209 }
  0x75   :  { %v217_v21 = vsel %vm216_vm1, %v198_v20, %v2727_v19 }
  0x78   :  { %v2734_v22 = vpop.permute.xlu0 %213 }
  0x79   :  { %v219_v23 = vsel %vm218_vm2, %v217_v21, %v2734_v22 }
  0x7a   :  { %v220_v24 = vpack.c.bf16 %v219_v23, %v219_v23 }
  0x7c   :  { %2016 = vmatmul.mubr.msk.bf16.vlgmr.msra.gmra.mxu1 %vm297_vm3, %v220_v24 }
  0x7d   :  { %529 = vmatpush1.bf16.msra.mxu1 %v2635_v4  ;;  %556 = vmatprep.mubr.bf16.mxu1 %v2558_v2 }
  0x7e   :  { %530 = vmatprep.subr.bf16.mxu1 %v2641_v5 }
  0x81   :  { %531 = vmatpush1.bf16.msra.mxu1 %v2647_v6 }
  0x82   :  { %532 = vmatprep.subr.bf16.mxu1 %v2654_v7 }
  0x85   :  { %533 = vmatpush1.bf16.msra.mxu1 %v2659_v8 }
  0x86   :  { %534 = vmatprep.subr.bf16.mxu1 %v2672_v11 }
  0x89   :  { %535 = vmatpush1.bf16.msra.mxu1 %v2680_v13 }
  0x8a   :  { %536 = vmatprep.subr.bf16.mxu1 %v2689_v15 }
  0x8d   :  { %537 = vmatpush1.bf16.msra.mxu1 %v2701_v16 }
  0x8e   :  { %538 = vmatprep.subr.bf16.mxu1 %v2707_v17 }
  0x91   :  { %539 = vmatpush1.bf16.msra.mxu1 %v2715_v18 }
  0x92   :  { %708 = vmatprep.subr.bf16.mxu1 %v2630_v3 }
  0xc9   :  { %v2160_v30 = vpop.f32.mrf.mxu0 }
  0xcb   :  { %v134_v33 = vpop.f32.mrf.mxu0 }
  0xcd   :  { %v2805_v63 = vpop.f32.mrf.mxu0 }
  0xcf   :  { %v2807_v0 = vpop.f32.mrf.mxu0 }
  0xd1   :  { %v2809_v1 = vpop.f32.mrf.mxu0 }
  0xd3   :  { %v2811_v9 = vpop.f32.mrf.mxu0 }
  0xd5   :  { %v2813_v10 = vpop.f32.mrf.mxu0 }
  0xd7   :  { %v2816_v14 = vpop.f32.mrf.mxu0 }
 0x13c   :  { %v335_v31 = vpop.f32.mrf.mxu1 }
 0x13d   :  { %v336_v32 = vadd.f32 %v335_v31, %v2761_v29 }
 0x13e   :  { %v337_v34 = vpop.f32.mrf.mxu1 }
 0x13f   :  { %v341_v35 = vadd.f32 %v336_v32, %v134_v33  ;;  %v2002_v34 = vld [vmem:[%s3512_s2 + $0x8] sm:$0xff] }
 0x140   :  { %v338_v36 = vpop.f32.mrf.mxu1 }
 0x141   :  { %2348 = vtanh.f32 %v341_v35  ;;  %v2017_v40 = vmul.f32 -1.442695, %v341_v35 }
 0x142   :  { %v339_v37 = vpop.f32.mrf.mxu1 }
 0x143   :  { %2350 = vpow2.f32 %v2017_v40 }
 0x14e   :  { %v2349_v38 = vpop.eup %2348 }
 0x14f   :  { %355 = vrot.lane.b32.xlu1 %v2349_v38, %s2560_s26 }
 0x150   :  { %v2351_v41 = vpop.eup %2350 }
 0x151   :  { %v345_v42 = vadd.f32 1.0, %v2351_v41 }
 0x153   :  { %350 = vrot.lane.b32.xlu1 %v203_v39, %s2559_s17  ;;  %2352 = vrcp.f32 %v345_v42 }
 0x160   :  { %v2353_v43 = vpop.eup %2352 }
 0x1c1   :  { %v356_v44 = vpop.permute.xlu1 %355 }
 0x1c2   :  { %v358_v45 = vmul.f32 %v2353_v43, %v356_v44 }
 0x1c4   :  { %360 = vrot.lane.b32.xlu0 %v358_v45, %s2559_s17 }
 0x1c5   :  { %v351_v46 = vpop.permute.xlu1 %350 }
 0x1c6   :  { %v353_v47 = vmul.f32 %v2353_v43, %v351_v46 }
 0x236   :  { %v361_v48 = vpop.permute.xlu0 %360 }
 0x237   :  { %v2770_v49 = vadd.f32 %v361_v48, %v353_v47 }
 0x239   :  { %2354 = vtanh.f32 %v2770_v49 }
 0x246   :  { %v2355_v56 = vpop.eup %2354 }
 0x247   :  { %366 = vrot.lane.b32.xlu1 %v2355_v56, %s2560_s26  ;;  %v2855_v56 = vld [vmem:[%s3508_s4 + $0x50] ss:$12 sps:$4 sm:$0xff]  }
 0x2b9   :  { %v367_v57 = vpop.permute.xlu1 %366 }
 0x2ba   :  { %v369_v58 = vmul.f32 %v2353_v43, %v367_v57 }
 0x2bc   :  { %371 = vrot.lane.b32.xlu0 %v369_v58, %s2559_s17 }
 0x32e   :  { %v372_v59 = vpop.permute.xlu0 %371 }
 0x32f   :  { %v374_v60 = vsel %vm216_vm1, %v372_v59, %v2727_v19  ;;  %v2819_v19 = vrot.slane %v2758_v28, %v228_v12  ;;  %v2863_v59 = vld [vmem:[%s3508_s4 + $0x38] ss:$12 sps:$4 sm:$0xff]  }
 0x330   :  { %v375_v61 = vsel %vm218_vm2, %v374_v60, %v2734_v22  ;;  %v2871_v60 = vld [vmem:[%s3508_s4 + $0x20] ss:$12 sps:$4 sm:$0xff]  }
 0x331   :  { %v376_v62 = vpack.c.bf16 %v375_v61, %v375_v61  ;;  %v2879_v61 = vld [vmem:[%s3508_s4 + $0x8] ss:$12 sps:$4 sm:$0xff]  }
 0x333   :  { %2018 = vmatmul.mubr.msk.bf16.vlgmr.msra.gmra.mxu0 %vm297_vm3, %v376_v62 }
 0x334   :  { %2171 = vmatpush3.bf16.msra.mxu0 %v2841_v54  ;;  %2182 = vmatprep.mubr.msk.bf16.mxu0 %vm2562_vm4, %v2561_v55 }
 0x335   :  { %2172 = vmatprep.subr.bf16.mxu0 %v2561_v55 }
 0x3f3   :  { %v414_v20 = vpop.f32.mrf.mxu0 }
 0x3f4   :  { %v415_v21 = vadd.f32 %v414_v20, %v2761_v29 }
 0x3f5   :  { %v416_v23 = vpop.f32.mrf.mxu0 }
 0x3f6   :  { %v421_v24 = vadd.f32 %v2160_v30, %v415_v21  ;;  %v417_v25 = vadd.f32 %v416_v23, %v2819_v19 }
 0x3f7   :  { %v418_v27 = vpop.f32.mrf.mxu0 }
 0x3f8   :  { %2356 = vtanh.f32 %v421_v24  ;;  %v2019_v35 = vmul.f32 -1.442695, %v421_v24  ;;  %v2020_v30 = vmul.f32 -1.442695, %v417_v25 }
 0x3f9   :  { %2358 = vtanh.f32 %v417_v25  ;;  %v419_v31 = vpop.f32.mrf.mxu0 }
 0x3fa   :  { %2360 = vpow2.f32 %v2019_v35 }
 0x3fb   :  { %2362 = vpow2.f32 %v2020_v30 }
 0x405   :  { %v2357_v32 = vpop.eup %2356 }
 0x406   :  { %v2359_v33 = vpop.eup %2358  ;;  %431 = vrot.lane.b32.xlu1 %v2357_v32, %s2560_s26 }
 0x407   :  { %459 = vrot.lane.b32.xlu0 %v2359_v33, %s2560_s26  ;;  %v2361_v36 = vpop.eup %2360 }
 0x408   :  { %v2363_v37 = vpop.eup %2362  ;;  %v425_v38 = vadd.f32 1.0, %v2361_v36 }
 0x409   :  { %v449_v39 = vadd.f32 1.0, %v2363_v37 }
 0x40a   :  { %454 = vrot.lane.b32.xlu1 %v2002_v34, %s2559_s17  ;;  %2364 = vrcp.f32 %v425_v38 }
 0x40b   :  { %2366 = vrcp.f32 %v449_v39 }
 0x417   :  { %v2365_v40 = vpop.eup %2364 }
 0x418   :  { %v2367_v42 = vpop.eup %2366  ;;  %v429_v47 = vmul.f32 %v2365_v40, %v2770_v49  ;;  %v2848_v49 = vld [vmem:[%s3508_s4 + $0x68] ss:$12 sps:$4 sm:$0xff]  }
 0x419   :  { %2173 = vmatpush3.bf16.msra.mxu0 %v2848_v49 }
 0x41a   :  { %2174 = vmatprep.subr.bf16.mxu0 %v2561_v55 }
 0x41d   :  { %2175 = vmatpush3.bf16.msra.mxu0 %v2855_v56 }
 0x41e   :  { %2176 = vmatprep.subr.bf16.mxu0 %v2561_v55 }
 0x421   :  { %2177 = vmatpush3.bf16.msra.mxu0 %v2863_v59 }
 0x422   :  { %2178 = vmatprep.subr.bf16.mxu0 %v2561_v55 }
 0x425   :  { %2179 = vmatpush3.bf16.msra.mxu0 %v2871_v60 }
 0x426   :  { %2180 = vmatprep.subr.bf16.mxu0 %v2561_v55 }
 0x429   :  { %2181 = vmatpush3.bf16.msra.mxu0 %v2879_v61 }
 0x42a   :  { %2186 = vmatprep.subr.bf16.mxu0 %v2561_v55 }
 0x478   :  { %v432_v41 = vpop.permute.xlu1 %431 }
 0x479   :  { %v460_v43 = vpop.permute.xlu0 %459  ;;  %v434_v44 = vmul.f32 %v2365_v40, %v432_v41 }
 0x47a   :  { %v462_v45 = vmul.f32 %v2367_v42, %v460_v43 }
 0x47b   :  { %436 = vrot.lane.b32.xlu0 %v434_v44, %s2559_s17 }
 0x47c   :  { %464 = vrot.lane.b32.xlu1 %v462_v45, %s2559_s17  ;;  %v455_v46 = vpop.permute.xlu1 %454 }
 0x47d   :  { %v457_v48 = vmul.f32 %v2367_v42, %v455_v46 }
 0x4ed   :  { %v437_v50 = vpop.permute.xlu0 %436 }
 0x4ee   :  { %v465_v51 = vpop.permute.xlu1 %464  ;;  %v2832_v52 = vadd.f32 %v437_v50, %v429_v47 }
 0x4ef   :  { %v2834_v53 = vadd.f32 %v465_v51, %v457_v48 }
 0x4f0   :  { %2368 = vtanh.f32 %v2832_v52 }
 0x4f1   :  { %2370 = vtanh.f32 %v2834_v53 }
 0x4fd   :  { %v2369_v57 = vpop.eup %2368 }
 0x4fe   :  { %v2371_v58 = vpop.eup %2370  ;;  %442 = vrot.lane.b32.xlu0 %v2369_v57, %s2560_s26 }
 0x4ff   :  { %470 = vrot.lane.b32.xlu1 %v2371_v58, %s2560_s26 }
 0x570   :  { %v443_v62 = vpop.permute.xlu0 %442 }
 0x571   :  { %v471_v12 = vpop.permute.xlu1 %470  ;;  %v445_v20 = vmul.f32 %v2365_v40, %v443_v62 }
 0x572   :  { %v473_v21 = vmul.f32 %v2367_v42, %v471_v12 }
 0x573   :  { %475 = vrot.lane.b32.xlu0 %v445_v20, %s2559_s17 }
 0x574   :  { %479 = vrot.lane.b32.xlu1 %v473_v21, %s2560_s26 }
 0x5e5   :  { %v476_v23 = vpop.permute.xlu0 %475 }
 0x5e6   :  { %v480_v24 = vpop.permute.xlu1 %479 }
 0x5e7   :  { %v482_v25 = vsel %vm216_vm1, %v476_v23, %v480_v24 }
 0x5e8   :  { %v483_v27 = vsel %vm218_vm2, %v482_v25, %v2734_v22  ;;  %v232_v22 = vsub.s32 2, %v2752_v26 }
 0x5e9   :  { %v484_v31 = vpack.c.bf16 %v483_v27, %v483_v27 }
 0x5ea   :  { %v2921_v33 = vrot.slane %v2758_v28, %v232_v22 }
 0x5eb   :  { %2027 = vmatmul.mubr.msk.bf16.vlgmr.msra.gmra.mxu1 %vm297_vm3, %v484_v31  ;;  %2183 = vmatmul.mubr.msk.bf16.vlgmr.msra.gmra.mxu0 %vm297_vm3, %v484_v31 }
 0x5ec   :  { %709 = vmatpush1.bf16.msra.mxu1 %v2635_v4  ;;  %2187 = vmatpush3.bf16.msra.mxu0 %v2841_v54 }
 0x5ed   :  { %710 = vmatprep.subr.bf16.mxu1 %v2641_v5  ;;  %2188 = vmatprep.subr.bf16.mxu0 %v2561_v55 }
 0x5ee   :  { %736 = vmatprep.mubr.bf16.mxu1 %v2558_v2  ;;  %2198 = vmatprep.mubr.msk.bf16.mxu0 %vm2562_vm4, %v2561_v55 }
 0x5f0   :  { %711 = vmatpush1.bf16.msra.mxu1 %v2647_v6  ;;  %2189 = vmatpush3.bf16.msra.mxu0 %v2848_v49 }
 0x5f1   :  { %712 = vmatprep.subr.bf16.mxu1 %v2654_v7  ;;  %2190 = vmatprep.subr.bf16.mxu0 %v2561_v55 }
 0x5f4   :  { %713 = vmatpush1.bf16.msra.mxu1 %v2659_v8  ;;  %2191 = vmatpush3.bf16.msra.mxu0 %v2855_v56 }
 0x5f5   :  { %714 = vmatprep.subr.bf16.mxu1 %v2672_v11  ;;  %2192 = vmatprep.subr.bf16.mxu0 %v2561_v55 }
 0x5f8   :  { %715 = vmatpush1.bf16.msra.mxu1 %v2680_v13  ;;  %2193 = vmatpush3.bf16.msra.mxu0 %v2863_v59 }
 0x5f9   :  { %716 = vmatprep.subr.bf16.mxu1 %v2689_v15  ;;  %2194 = vmatprep.subr.bf16.mxu0 %v2561_v55 }
 0x5fc   :  { %717 = vmatpush1.bf16.msra.mxu1 %v2701_v16  ;;  %2195 = vmatpush3.bf16.msra.mxu0 %v2871_v60 }
 0x5fd   :  { %718 = vmatprep.subr.bf16.mxu1 %v2707_v17  ;;  %2196 = vmatprep.subr.bf16.mxu0 %v2561_v55 }
 0x600   :  { %719 = vmatpush1.bf16.msra.mxu1 %v2715_v18  ;;  %2197 = vmatpush3.bf16.msra.mxu0 %v2879_v61 }
 0x601   :  { %884 = vmatprep.subr.bf16.mxu1 %v2630_v3  ;;  %2202 = vmatprep.subr.bf16.mxu0 %v2561_v55 }
 0x6ab   :  { %v558_v32 = vpop.f32.mrf.mxu1  ;;  %v599_v34 = vpop.f32.mrf.mxu0 }
 0x6ac   :  { %v559_v35 = vadd.f32 %v558_v32, %v2761_v29  ;;  %v600_v38 = vadd.f32 %v599_v34, %v2921_v33 }
 0x6ad   :  { %v560_v30 = vpop.f32.mrf.mxu1  ;;  %v2184_v36 = vpop.f32.mrf.mxu0 }
 0x6ae   :  { %v605_v37 = vadd.f32 %v559_v35, %v2807_v0  ;;  %v561_v41 = vadd.f32 %v560_v30, %v2819_v19  ;;  %v2003_v0 = vld [vmem:[%s3512_s2 + $0x10] sm:$0xff]  ;;  %v2031_v46 = vmul.f32 -1.442695, %v600_v38  ;;  %s2563_s2 = smov 96  }
 0x6af   :  { %v562_v39 = vpop.f32.mrf.mxu1  ;;  %v602_v40 = vpop.f32.mrf.mxu0 }
 0x6b0   :  { %2372 = vtanh.f32 %v605_v37  ;;  %v2029_v45 = vmul.f32 -1.442695, %v605_v37  ;;  %v2030_v47 = vmul.f32 -1.442695, %v561_v41 }
 0x6b1   :  { %v563_v42 = vpop.f32.mrf.mxu1  ;;  %v2185_v26 = vpop.f32.mrf.mxu0  ;;  %2374 = vtanh.f32 %v600_v38 }
 0x6b2   :  { %2376 = vtanh.f32 %v561_v41 }
 0x6b3   :  { %2378 = vpow2.f32 %v2029_v45 }
 0x6b4   :  { %2380 = vpow2.f32 %v2031_v46 }
 0x6b5   :  { %2382 = vpow2.f32 %v2030_v47 }
 0x6bd   :  { %v2373_v28 = vpop.eup %2372 }
 0x6be   :  { %615 = vrot.lane.b32.xlu0 %v2373_v28, %s2560_s26  ;;  %v2375_v43 = vpop.eup %2374 }
 0x6bf   :  { %v2377_v44 = vpop.eup %2376 }
 0x6c0   :  { %639 = vrot.lane.b32.xlu1 %v2377_v44, %s2560_s26  ;;  %v2379_v48 = vpop.eup %2378 }
 0x6c1   :  { %v2381_v50 = vpop.eup %2380  ;;  %v609_v51 = vadd.f32 1.0, %v2379_v48 }
 0x6c2   :  { %667 = vrot.lane.b32.xlu0 %v2375_v43, %s2560_s26  ;;  %v2383_v57 = vpop.eup %2382  ;;  %v657_v58 = vadd.f32 1.0, %v2381_v50 }
 0x6c3   :  { %2384 = vrcp.f32 %v609_v51  ;;  %v633_v62 = vadd.f32 1.0, %v2383_v57 }
 0x6c4   :  { %662 = vrot.lane.b32.xlu1 %v2003_v0, %s2559_s17  ;;  %2386 = vrcp.f32 %v657_v58 }
 0x6c5   :  { %2388 = vrcp.f32 %v633_v62 }
 0x6d0   :  { %v2385_v12 = vpop.eup %2384 }
 0x6d1   :  { %v2387_v23 = vpop.eup %2386  ;;  %v613_v32 = vmul.f32 %v2385_v12, %v2832_v52 }
 0x6d2   :  { %v2389_v24 = vpop.eup %2388 }
 0x6d3   :  { %v637_v37 = vmul.f32 %v2389_v24, %v2834_v53 }
 0x730   :  { %v616_v20 = vpop.permute.xlu0 %615 }
 0x731   :  { %v618_v21 = vmul.f32 %v2385_v12, %v616_v20 }
 0x732   :  { %v640_v25 = vpop.permute.xlu1 %639 }
 0x733   :  { %620 = vrot.lane.b32.xlu0 %v618_v21, %s2559_s17  ;;  %v642_v31 = vmul.f32 %v2389_v24, %v640_v25 }
 0x734   :  { %v668_v27 = vpop.permute.xlu0 %667 }
 0x735   :  { %v670_v22 = vmul.f32 %v2387_v23, %v668_v27  ;;  %644 = vrot.lane.b32.xlu1 %v642_v31, %s2559_s17 }
 0x736   :  { %v663_v34 = vpop.permute.xlu1 %662 }
 0x737   :  { %672 = vrot.lane.b32.xlu0 %v670_v22, %s2559_s17  ;;  %v665_v36 = vmul.f32 %v2387_v23, %v663_v34 }
 0x7a5   :  { %v621_v35 = vpop.permute.xlu0 %620 }
 0x7a6   :  { %v2938_v30 = vadd.f32 %v621_v35, %v613_v32 }
 0x7a7   :  { %v645_v38 = vpop.permute.xlu1 %644 }
 0x7a8   :  { %2390 = vtanh.f32 %v2938_v30  ;;  %v2942_v40 = vadd.f32 %v645_v38, %v637_v37 }
 0x7a9   :  { %v673_v39 = vpop.permute.xlu0 %672 }
 0x7aa   :  { %v2944_v41 = vadd.f32 %v673_v39, %v665_v36  ;;  %2392 = vtanh.f32 %v2942_v40 }
 0x7ac   :  { %2394 = vtanh.f32 %v2944_v41 }
 0x7b5   :  { %v2391_v52 = vpop.eup %2390 }
 0x7b6   :  { %626 = vrot.lane.b32.xlu1 %v2391_v52, %s2560_s26 }
 0x7b7   :  { %v2393_v42 = vpop.eup %2392 }
 0x7b8   :  { %650 = vrot.lane.b32.xlu0 %v2393_v42, %s2560_s26 }
 0x7b9   :  { %v2395_v26 = vpop.eup %2394 }
 0x7ba   :  { %678 = vrot.lane.b32.xlu1 %v2395_v26, %s2560_s26 }
 0x828   :  { %v627_v53 = vpop.permute.xlu1 %626 }
 0x829   :  { %v629_v28 = vmul.f32 %v2385_v12, %v627_v53 }
 0x82a   :  { %v651_v43 = vpop.permute.xlu0 %650 }
 0x82b   :  { %688 = vrot.lane.b32.xlu0 %v629_v28, %s2559_s17  ;;  %v653_v44 = vmul.f32 %v2389_v24, %v651_v43 }
 0x82c   :  { %v679_v0 = vpop.permute.xlu1 %678 }
 0x82d   :  { %v2952_v45 = vmul.f32 %v2387_v23, %v679_v0  ;;  %692 = vrot.lane.b32.xlu1 %v653_v44, %s2560_s26 }
 0x82f   :  { %695 = vrot.lane.b32.xlu0 %v2952_v45, %s2563_s2 }
 0x89d   :  { %v689_v46 = vpop.permute.xlu0 %688 }
 0x89f   :  { %v693_v47 = vpop.permute.xlu1 %692 }
 0x8a0   :  { %v698_v48 = vsel %vm216_vm1, %v689_v46, %v693_v47 }
 0x8a1   :  { %v696_v50 = vpop.permute.xlu0 %695 }
 0x8a2   :  { %v699_v51 = vsel %vm218_vm2, %v698_v48, %v696_v50 }
 0x8a3   :  { %v700_v57 = vpack.c.bf16 %v699_v51, %v699_v51 }
 0x8a5   :  { %2032 = vmatmul.mubr.msk.bf16.vlgmr.msra.gmra.mxu1 %vm297_vm3, %v700_v57  ;;  %2199 = vmatmul.mubr.msk.bf16.vlgmr.msra.gmra.mxu0 %vm297_vm3, %v700_v57 }
 0x8a6   :  { %885 = vmatpush1.bf16.msra.mxu1 %v2635_v4  ;;  %2203 = vmatpush3.bf16.msra.mxu0 %v2841_v54 }
 0x8a7   :  { %886 = vmatprep.subr.bf16.mxu1 %v2641_v5  ;;  %2204 = vmatprep.subr.bf16.mxu0 %v2561_v55 }
 0x8a8   :  { %912 = vmatprep.mubr.bf16.mxu1 %v2558_v2  ;;  %2214 = vmatprep.mubr.msk.bf16.mxu0 %vm2562_vm4, %v2561_v55 }
 0x8aa   :  { %887 = vmatpush1.bf16.msra.mxu1 %v2647_v6  ;;  %2205 = vmatpush3.bf16.msra.mxu0 %v2848_v49 }
 0x8ab   :  { %888 = vmatprep.subr.bf16.mxu1 %v2654_v7  ;;  %2206 = vmatprep.subr.bf16.mxu0 %v2561_v55 }
 0x8ae   :  { %889 = vmatpush1.bf16.msra.mxu1 %v2659_v8  ;;  %2207 = vmatpush3.bf16.msra.mxu0 %v2855_v56 }
 0x8af   :  { %890 = vmatprep.subr.bf16.mxu1 %v2672_v11  ;;  %2208 = vmatprep.subr.bf16.mxu0 %v2561_v55 }
 0x8b2   :  { %891 = vmatpush1.bf16.msra.mxu1 %v2680_v13  ;;  %2209 = vmatpush3.bf16.msra.mxu0 %v2863_v59 }
 0x8b3   :  { %892 = vmatprep.subr.bf16.mxu1 %v2689_v15  ;;  %2210 = vmatprep.subr.bf16.mxu0 %v2561_v55 }
 0x8b6   :  { %893 = vmatpush1.bf16.msra.mxu1 %v2701_v16  ;;  %2211 = vmatpush3.bf16.msra.mxu0 %v2871_v60 }
 0x8b7   :  { %894 = vmatprep.subr.bf16.mxu1 %v2707_v17  ;;  %2212 = vmatprep.subr.bf16.mxu0 %v2561_v55 }
 0x8ba   :  { %895 = vmatpush1.bf16.msra.mxu1 %v2715_v18  ;;  %2213 = vmatpush3.bf16.msra.mxu0 %v2879_v61 }
 0x8bb   :  { %1060 = vmatprep.subr.bf16.mxu1 %v2630_v3  ;;  %2218 = vmatprep.subr.bf16.mxu0 %v2561_v55 }
 0x965   :  { %v738_v58 = vpop.f32.mrf.mxu1  ;;  %v779_v62 = vpop.f32.mrf.mxu0 }
 0x966   :  { %v739_v12 = vadd.f32 %v738_v58, %v2761_v29  ;;  %v780_v24 = vadd.f32 %v779_v62, %v2921_v33 }
 0x967   :  { %v740_v20 = vpop.f32.mrf.mxu1  ;;  %v2200_v21 = vpop.f32.mrf.mxu0 }
 0x968   :  { %v785_v23 = vadd.f32 %v2805_v63, %v739_v12  ;;  %v741_v31 = vadd.f32 %v740_v20, %v2819_v19  ;;  %v2036_v37 = vmul.f32 -1.442695, %v780_v24 }
 0x969   :  { %v742_v25 = vpop.f32.mrf.mxu1  ;;  %v782_v27 = vpop.f32.mrf.mxu0 }
 0x96a   :  { %2396 = vtanh.f32 %v785_v23  ;;  %v2034_v63 = vmul.f32 -1.442695, %v785_v23  ;;  %v2035_v38 = vmul.f32 -1.442695, %v741_v31 }
 0x96b   :  { %v743_v22 = vpop.f32.mrf.mxu1  ;;  %v2201_v32 = vpop.f32.mrf.mxu0  ;;  %2398 = vtanh.f32 %v780_v24 }
 0x96c   :  { %2400 = vtanh.f32 %v741_v31 }
 0x96d   :  { %2402 = vpow2.f32 %v2034_v63 }
 0x96e   :  { %2404 = vpow2.f32 %v2036_v37 }
 0x96f   :  { %2406 = vpow2.f32 %v2035_v38 }
 0x977   :  { %v2397_v34 = vpop.eup %2396 }
 0x978   :  { %795 = vrot.lane.b32.xlu1 %v2397_v34, %s2560_s26  ;;  %v2399_v35 = vpop.eup %2398 }
 0x979   :  { %v2401_v36 = vpop.eup %2400 }
 0x97a   :  { %819 = vrot.lane.b32.xlu0 %v2401_v36, %s2560_s26  ;;  %v2403_v39 = vpop.eup %2402 }
 0x97b   :  { %v2405_v52 = vpop.eup %2404  ;;  %v789_v42 = vadd.f32 1.0, %v2403_v39 }
 0x97c   :  { %843 = vrot.lane.b32.xlu1 %v2399_v35, %s2560_s26  ;;  %v2407_v26 = vpop.eup %2406  ;;  %v837_v53 = vadd.f32 1.0, %v2405_v52 }
 0x97d   :  { %2408 = vrcp.f32 %v789_v42  ;;  %v813_v28 = vadd.f32 1.0, %v2407_v26 }
 0x97e   :  { %2410 = vrcp.f32 %v837_v53 }
 0x97f   :  { %2412 = vrcp.f32 %v813_v28 }
 0x98a   :  { %v2409_v43 = vpop.eup %2408 }
 0x98b   :  { %v2411_v46 = vpop.eup %2410  ;;  %v793_v58 = vmul.f32 %v2409_v43, %v2938_v30 }
 0x98c   :  { %v2413_v47 = vpop.eup %2412  ;;  %v841_v21 = vmul.f32 %v2411_v46, %v2944_v41 }
 0x98d   :  { %v817_v20 = vmul.f32 %v2413_v47, %v2942_v40 }
 0x9ea   :  { %v796_v44 = vpop.permute.xlu1 %795 }
 0x9eb   :  { %v798_v0 = vmul.f32 %v2409_v43, %v796_v44 }
 0x9ec   :  { %v820_v48 = vpop.permute.xlu0 %819 }
 0x9ed   :  { %800 = vrot.lane.b32.xlu0 %v798_v0, %s2559_s17  ;;  %v822_v51 = vmul.f32 %v2413_v47, %v820_v48 }
 0x9ee   :  { %v844_v50 = vpop.permute.xlu1 %843 }
 0x9ef   :  { %v846_v57 = vmul.f32 %v2411_v46, %v844_v50  ;;  %824 = vrot.lane.b32.xlu1 %v822_v51, %s2559_s17 }
 0x9f1   :  { %848 = vrot.lane.b32.xlu0 %v846_v57, %s2559_s17 }
 0xa5f   :  { %v801_v62 = vpop.permute.xlu0 %800 }
 0xa60   :  { %v2999_v12 = vadd.f32 %v801_v62, %v793_v58 }
 0xa61   :  { %v825_v23 = vpop.permute.xlu1 %824 }
 0xa62   :  { %2414 = vtanh.f32 %v2999_v12  ;;  %v3004_v25 = vadd.f32 %v825_v23, %v817_v20 }
 0xa63   :  { %v849_v24 = vpop.permute.xlu0 %848 }
 0xa64   :  { %v3006_v27 = vadd.f32 %v849_v24, %v841_v21  ;;  %2416 = vtanh.f32 %v3004_v25 }
 0xa66   :  { %2418 = vtanh.f32 %v3006_v27 }
 0xa6f   :  { %v2415_v30 = vpop.eup %2414 }
 0xa70   :  { %806 = vrot.lane.b32.xlu1 %v2415_v30, %s2560_s26 }
 0xa71   :  { %v2417_v31 = vpop.eup %2416 }
 0xa72   :  { %830 = vrot.lane.b32.xlu0 %v2417_v31, %s2560_s26 }
 0xa73   :  { %v2419_v22 = vpop.eup %2418 }
 0xa74   :  { %854 = vrot.lane.b32.xlu1 %v2419_v22, %s2560_s26 }
 0xae2   :  { %v807_v40 = vpop.permute.xlu1 %806 }
 0xae3   :  { %v809_v41 = vmul.f32 %v2409_v43, %v807_v40 }
 0xae4   :  { %v831_v32 = vpop.permute.xlu0 %830 }
 0xae5   :  { %864 = vrot.lane.b32.xlu0 %v809_v41, %s2559_s17  ;;  %v833_v34 = vmul.f32 %v2413_v47, %v831_v32 }
 0xae6   :  { %v855_v35 = vpop.permute.xlu1 %854 }
 0xae7   :  { %v3014_v36 = vmul.f32 %v2411_v46, %v855_v35  ;;  %868 = vrot.lane.b32.xlu1 %v833_v34, %s2560_s26 }
 0xae9   :  { %871 = vrot.lane.b32.xlu0 %v3014_v36, %s2563_s2 }
 0xb57   :  { %v865_v63 = vpop.permute.xlu0 %864 }
 0xb59   :  { %v869_v37 = vpop.permute.xlu1 %868 }
 0xb5a   :  { %v874_v38 = vsel %vm216_vm1, %v865_v63, %v869_v37 }
 0xb5b   :  { %v872_v39 = vpop.permute.xlu0 %871 }
 0xb5c   :  { %v875_v52 = vsel %vm218_vm2, %v874_v38, %v872_v39 }
 0xb5d   :  { %v876_v42 = vpack.c.bf16 %v875_v52, %v875_v52 }
 0xb5f   :  { %2037 = vmatmul.mubr.msk.bf16.vlgmr.msra.gmra.mxu1 %vm297_vm3, %v876_v42  ;;  %2215 = vmatmul.mubr.msk.bf16.vlgmr.msra.gmra.mxu0 %vm297_vm3, %v876_v42 }
 0xb60   :  { %1061 = vmatpush1.bf16.msra.mxu1 %v2635_v4  ;;  %2219 = vmatpush3.bf16.msra.mxu0 %v2841_v54 }
 0xb61   :  { %1062 = vmatprep.subr.bf16.mxu1 %v2641_v5  ;;  %2220 = vmatprep.subr.bf16.mxu0 %v2561_v55 }
 0xb62   :  { %1088 = vmatprep.mubr.bf16.mxu1 %v2558_v2  ;;  %2230 = vmatprep.mubr.msk.bf16.mxu0 %vm2562_vm4, %v2561_v55 }
 0xb64   :  { %1063 = vmatpush1.bf16.msra.mxu1 %v2647_v6  ;;  %2221 = vmatpush3.bf16.msra.mxu0 %v2848_v49 }
 0xb65   :  { %1064 = vmatprep.subr.bf16.mxu1 %v2654_v7  ;;  %2222 = vmatprep.subr.bf16.mxu0 %v2561_v55 }
 0xb68   :  { %1065 = vmatpush1.bf16.msra.mxu1 %v2659_v8  ;;  %2223 = vmatpush3.bf16.msra.mxu0 %v2855_v56 }
 0xb69   :  { %1066 = vmatprep.subr.bf16.mxu1 %v2672_v11  ;;  %2224 = vmatprep.subr.bf16.mxu0 %v2561_v55 }
 0xb6c   :  { %1067 = vmatpush1.bf16.msra.mxu1 %v2680_v13  ;;  %2225 = vmatpush3.bf16.msra.mxu0 %v2863_v59 }
 0xb6d   :  { %1068 = vmatprep.subr.bf16.mxu1 %v2689_v15  ;;  %2226 = vmatprep.subr.bf16.mxu0 %v2561_v55 }
 0xb70   :  { %1069 = vmatpush1.bf16.msra.mxu1 %v2701_v16  ;;  %2227 = vmatpush3.bf16.msra.mxu0 %v2871_v60 }
 0xb71   :  { %1070 = vmatprep.subr.bf16.mxu1 %v2707_v17  ;;  %2228 = vmatprep.subr.bf16.mxu0 %v2561_v55 }
 0xb74   :  { %1071 = vmatpush1.bf16.msra.mxu1 %v2715_v18  ;;  %2229 = vmatpush3.bf16.msra.mxu0 %v2879_v61 }
 0xb75   :  { %1236 = vmatprep.subr.bf16.mxu1 %v2630_v3  ;;  %2234 = vmatprep.subr.bf16.mxu0 %v2561_v55 }
 0xc1f   :  { %v914_v4 = vpop.f32.mrf.mxu1  ;;  %v955_v5 = vpop.f32.mrf.mxu0 }
 0xc20   :  { %v915_v6 = vadd.f32 %v914_v4, %v2761_v29  ;;  %v956_v13 = vadd.f32 %v955_v5, %v2921_v33 }
 0xc21   :  { %v916_v7 = vpop.f32.mrf.mxu1  ;;  %v2216_v8 = vpop.f32.mrf.mxu0 }
 0xc22   :  { %v961_v11 = vadd.f32 %v915_v6, %v2811_v9  ;;  %v917_v17 = vadd.f32 %v916_v7, %v2819_v19  ;;  %v2041_v43 = vmul.f32 -1.442695, %v956_v13 }
 0xc23   :  { %v918_v15 = vpop.f32.mrf.mxu1  ;;  %v958_v16 = vpop.f32.mrf.mxu0 }
 0xc24   :  { %2420 = vtanh.f32 %v961_v11  ;;  %v2039_v9 = vmul.f32 -1.442695, %v961_v11  ;;  %v2040_v44 = vmul.f32 -1.442695, %v917_v17 }
 0xc25   :  { %v919_v18 = vpop.f32.mrf.mxu1  ;;  %v2217_v26 = vpop.f32.mrf.mxu0  ;;  %2422 = vtanh.f32 %v956_v13 }
 0xc26   :  { %2424 = vtanh.f32 %v917_v17  ;;  %v3088_v17 = vld [vmem:[%s3508_s4 + $0x78] ss:$12 sps:$4 sm:$0xff]   ;;  %v3105_v26 = vld [vmem:[%s3508_s4 + $0x60] ss:$12 sps:$4 sm:$0xff]  }
 0xc27   :  { %2426 = vpow2.f32 %v2039_v9  ;;  %v3095_v18 = vld [vmem:[%s3508_s4 + $0x64] ss:$12 sps:$4 sm:$0xff]  }
 0xc28   :  { %2428 = vpow2.f32 %v2041_v43  ;;  %v3133_v9 = vld [vmem:[%s3508_s4 + $0x30] ss:$12 sps:$4 sm:$0xff]  }
 0xc29   :  { %2430 = vpow2.f32 %v2040_v44  ;;  %v3140_v43 = vld [vmem:[%s3508_s4 + $0x1c] ss:$12 sps:$4 sm:$0xff]   ;;  %v3147_v44 = vld [vmem:[%s3508_s4 + $0x18] ss:$12 sps:$4 sm:$0xff]  }
 0xc31   :  { %v2421_v3 = vpop.eup %2420 }
 0xc32   :  { %971 = vrot.lane.b32.xlu1 %v2421_v3, %s2560_s26  ;;  %v2423_v53 = vpop.eup %2422  ;;  %v3112_v3 = vld [vmem:[%s3508_s4 + $0x4c] ss:$12 sps:$4 sm:$0xff]  }
 0xc33   :  { %v2425_v28 = vpop.eup %2424 }
 0xc34   :  { %995 = vrot.lane.b32.xlu0 %v2425_v28, %s2560_s26  ;;  %v2427_v0 = vpop.eup %2426  ;;  %v3126_v28 = vld [vmem:[%s3508_s4 + $0x34] ss:$12 sps:$4 sm:$0xff]  }
 0xc35   :  { %v2429_v46 = vpop.eup %2428  ;;  %v965_v47 = vadd.f32 1.0, %v2427_v0  ;;  %v3154_v0 = vld [vmem:[%s3508_s4 + $0x4] ss:$12 sps:$4 sm:$0xff]  }
 0xc36   :  { %1019 = vrot.lane.b32.xlu1 %v2423_v53, %s2560_s26  ;;  %v2431_v48 = vpop.eup %2430  ;;  %v1013_v50 = vadd.f32 1.0, %v2429_v46  ;;  %v3119_v53 = vld [vmem:[%s3508_s4 + $0x48] ss:$12 sps:$4 sm:$0xff]   ;;  %v3161_v46 = vld [vmem:[%s3508_s4] ss:$12 sps:$4 sm:$0xff]  }
 0xc37   :  { %2432 = vrcp.f32 %v965_v47  ;;  %v989_v51 = vadd.f32 1.0, %v2431_v48  ;;  %v3168_v47 = vld [vmem:[%s3508_s4 + $0x7c] ss:$12 sps:$4 sm:$0xff]  }
 0xc38   :  { %2434 = vrcp.f32 %v1013_v50 }
 0xc39   :  { %2436 = vrcp.f32 %v989_v51 }
 0xc44   :  { %v2433_v57 = vpop.eup %2432 }
 0xc45   :  { %v2435_v20 = vpop.eup %2434  ;;  %v969_v22 = vmul.f32 %v2433_v57, %v2999_v12 }
 0xc46   :  { %v2437_v21 = vpop.eup %2436  ;;  %v1017_v34 = vmul.f32 %v2435_v20, %v3006_v27 }
 0xc47   :  { %v993_v32 = vmul.f32 %v2437_v21, %v3004_v25 }
 0xca4   :  { %v972_v58 = vpop.permute.xlu1 %971 }
 0xca5   :  { %v974_v62 = vmul.f32 %v2433_v57, %v972_v58 }
 0xca6   :  { %v996_v23 = vpop.permute.xlu0 %995 }
 0xca7   :  { %976 = vrot.lane.b32.xlu0 %v974_v62, %s2559_s17  ;;  %v998_v30 = vmul.f32 %v2437_v21, %v996_v23 }
 0xca8   :  { %v1020_v24 = vpop.permute.xlu1 %1019 }
 0xca9   :  { %v1022_v31 = vmul.f32 %v2435_v20, %v1020_v24  ;;  %1000 = vrot.lane.b32.xlu1 %v998_v30, %s2559_s17 }
 0xcab   :  { %1024 = vrot.lane.b32.xlu0 %v1022_v31, %s2559_s17 }
 0xd19   :  { %v977_v40 = vpop.permute.xlu0 %976 }
 0xd1a   :  { %v3061_v41 = vadd.f32 %v977_v40, %v969_v22 }
 0xd1b   :  { %v1001_v35 = vpop.permute.xlu1 %1000 }
 0xd1c   :  { %2438 = vtanh.f32 %v3061_v41  ;;  %v3066_v37 = vadd.f32 %v1001_v35, %v993_v32 }
 0xd1d   :  { %v1025_v63 = vpop.permute.xlu0 %1024 }
 0xd1e   :  { %v3068_v38 = vadd.f32 %v1025_v63, %v1017_v34  ;;  %2440 = vtanh.f32 %v3066_v37 }
 0xd20   :  { %2442 = vtanh.f32 %v3068_v38 }
 0xd29   :  { %v2439_v12 = vpop.eup %2438 }
 0xd2a   :  { %982 = vrot.lane.b32.xlu1 %v2439_v12, %s2560_s26 }
 0xd2b   :  { %v2441_v39 = vpop.eup %2440 }
 0xd2c   :  { %1006 = vrot.lane.b32.xlu0 %v2441_v39, %s2560_s26 }
 0xd2d   :  { %v2443_v52 = vpop.eup %2442 }
 0xd2e   :  { %1030 = vrot.lane.b32.xlu1 %v2443_v52, %s2560_s26 }
 0xd9c   :  { %v983_v25 = vpop.permute.xlu1 %982 }
 0xd9d   :  { %v985_v27 = vmul.f32 %v2433_v57, %v983_v25 }
 0xd9e   :  { %v1007_v42 = vpop.permute.xlu0 %1006 }
 0xd9f   :  { %1040 = vrot.lane.b32.xlu0 %v985_v27, %s2559_s17  ;;  %v1009_v4 = vmul.f32 %v2437_v21, %v1007_v42 }
 0xda0   :  { %v1031_v5 = vpop.permute.xlu1 %1030 }
 0xda1   :  { %v3076_v6 = vmul.f32 %v2435_v20, %v1031_v5  ;;  %1044 = vrot.lane.b32.xlu1 %v1009_v4, %s2560_s26 }
 0xda3   :  { %1047 = vrot.lane.b32.xlu0 %v3076_v6, %s2563_s2 }
 0xe11   :  { %v1041_v7 = vpop.permute.xlu0 %1040 }
 0xe13   :  { %v1045_v8 = vpop.permute.xlu1 %1044 }
 0xe14   :  { %v1050_v11 = vsel %vm216_vm1, %v1041_v7, %v1045_v8 }
 0xe15   :  { %v1048_v13 = vpop.permute.xlu0 %1047 }
 0xe16   :  { %v1051_v15 = vsel %vm218_vm2, %v1050_v11, %v1048_v13 }
 0xe17   :  { %v1052_v16 = vpack.c.bf16 %v1051_v15, %v1051_v15 }
 0xe19   :  { %2042 = vmatmul.mubr.msk.bf16.vlgmr.msra.gmra.mxu1 %vm297_vm3, %v1052_v16  ;;  %2231 = vmatmul.mubr.msk.bf16.vlgmr.msra.gmra.mxu0 %vm297_vm3, %v1052_v16 }
 0xe1a   :  { %1237 = vmatpush1.bf16.msra.mxu1 %v3088_v17  ;;  %2235 = vmatpush3.bf16.msra.mxu0 %v2841_v54 }
 0xe1b   :  { %1238 = vmatprep.subr.bf16.mxu1 %v3095_v18  ;;  %2236 = vmatprep.subr.bf16.mxu0 %v2561_v55 }
 0xe1c   :  { %1264 = vmatprep.mubr.bf16.mxu1 %v2558_v2  ;;  %2246 = vmatprep.mubr.msk.bf16.mxu0 %vm2562_vm4, %v2561_v55 }
 0xe1e   :  { %1239 = vmatpush1.bf16.msra.mxu1 %v3105_v26  ;;  %2237 = vmatpush3.bf16.msra.mxu0 %v2848_v49 }
 0xe1f   :  { %1240 = vmatprep.subr.bf16.mxu1 %v3112_v3  ;;  %2238 = vmatprep.subr.bf16.mxu0 %v2561_v55 }
 0xe22   :  { %1241 = vmatpush1.bf16.msra.mxu1 %v3119_v53  ;;  %2239 = vmatpush3.bf16.msra.mxu0 %v2855_v56 }
 0xe23   :  { %1242 = vmatprep.subr.bf16.mxu1 %v3126_v28  ;;  %2240 = vmatprep.subr.bf16.mxu0 %v2561_v55 }
 0xe26   :  { %1243 = vmatpush1.bf16.msra.mxu1 %v3133_v9  ;;  %2241 = vmatpush3.bf16.msra.mxu0 %v2863_v59 }
 0xe27   :  { %1244 = vmatprep.subr.bf16.mxu1 %v3140_v43  ;;  %2242 = vmatprep.subr.bf16.mxu0 %v2561_v55 }
 0xe2a   :  { %1245 = vmatpush1.bf16.msra.mxu1 %v3147_v44  ;;  %2243 = vmatpush3.bf16.msra.mxu0 %v2871_v60 }
 0xe2b   :  { %1246 = vmatprep.subr.bf16.mxu1 %v3154_v0  ;;  %2244 = vmatprep.subr.bf16.mxu0 %v2561_v55 }
 0xe2e   :  { %1247 = vmatpush1.bf16.msra.mxu1 %v3161_v46  ;;  %2245 = vmatpush3.bf16.msra.mxu0 %v2879_v61 }
 0xe2f   :  { %1412 = vmatprep.subr.bf16.mxu1 %v3168_v47  ;;  %2250 = vmatprep.subr.bf16.mxu0 %v2561_v55 }
 0xed9   :  { %v1090_v48 = vpop.f32.mrf.mxu1  ;;  %v1131_v50 = vpop.f32.mrf.mxu0 }
 0xeda   :  { %v1091_v51 = vadd.f32 %v1090_v48, %v2761_v29  ;;  %v1132_v20 = vadd.f32 %v1131_v50, %v2921_v33 }
 0xedb   :  { %v1092_v57 = vpop.f32.mrf.mxu1  ;;  %v2232_v58 = vpop.f32.mrf.mxu0 }
 0xedc   :  { %v1137_v62 = vadd.f32 %v2809_v1, %v1091_v51  ;;  %v1093_v24 = vadd.f32 %v1092_v57, %v2819_v19  ;;  %v2046_v34 = vmul.f32 -1.442695, %v1132_v20 }
 0xedd   :  { %v1094_v21 = vpop.f32.mrf.mxu1  ;;  %v1134_v23 = vpop.f32.mrf.mxu0 }
 0xede   :  { %2444 = vtanh.f32 %v1137_v62  ;;  %v2044_v1 = vmul.f32 -1.442695, %v1137_v62  ;;  %v2045_v35 = vmul.f32 -1.442695, %v1093_v24 }
 0xedf   :  { %v1095_v30 = vpop.f32.mrf.mxu1  ;;  %v2233_v31 = vpop.f32.mrf.mxu0  ;;  %2446 = vtanh.f32 %v1132_v20 }
 0xee0   :  { %2448 = vtanh.f32 %v1093_v24 }
 0xee1   :  { %2450 = vpow2.f32 %v2044_v1 }
 0xee2   :  { %2452 = vpow2.f32 %v2046_v34 }
 0xee3   :  { %2454 = vpow2.f32 %v2045_v35 }
 0xeeb   :  { %v2445_v22 = vpop.eup %2444 }
 0xeec   :  { %1147 = vrot.lane.b32.xlu1 %v2445_v22, %s2560_s26  ;;  %v2447_v40 = vpop.eup %2446 }
 0xeed   :  { %v2449_v32 = vpop.eup %2448 }
 0xeee   :  { %1171 = vrot.lane.b32.xlu0 %v2449_v32, %s2560_s26  ;;  %v2451_v63 = vpop.eup %2450 }
 0xeef   :  { %v2453_v12 = vpop.eup %2452  ;;  %v1141_v39 = vadd.f32 1.0, %v2451_v63 }
 0xef0   :  { %1195 = vrot.lane.b32.xlu1 %v2447_v40, %s2560_s26  ;;  %v2455_v52 = vpop.eup %2454  ;;  %v1189_v25 = vadd.f32 1.0, %v2453_v12 }
 0xef1   :  { %2456 = vrcp.f32 %v1141_v39  ;;  %v1165_v27 = vadd.f32 1.0, %v2455_v52 }
 0xef2   :  { %2458 = vrcp.f32 %v1189_v25 }
 0xef3   :  { %2460 = vrcp.f32 %v1165_v27 }
 0xefe   :  { %v2457_v42 = vpop.eup %2456 }
 0xeff   :  { %v2459_v7 = vpop.eup %2458  ;;  %v1145_v48 = vmul.f32 %v2457_v42, %v3061_v41 }
 0xf00   :  { %v2461_v8 = vpop.eup %2460  ;;  %v1193_v58 = vmul.f32 %v2459_v7, %v3068_v38 }
 0xf01   :  { %v1169_v57 = vmul.f32 %v2461_v8, %v3066_v37 }
 0xf5e   :  { %v1148_v4 = vpop.permute.xlu1 %1147 }
 0xf5f   :  { %v1150_v5 = vmul.f32 %v2457_v42, %v1148_v4 }
 0xf60   :  { %v1172_v11 = vpop.permute.xlu0 %1171 }
 0xf61   :  { %1152 = vrot.lane.b32.xlu0 %v1150_v5, %s2559_s17  ;;  %v1174_v15 = vmul.f32 %v2461_v8, %v1172_v11 }
 0xf62   :  { %v1196_v13 = vpop.permute.xlu1 %1195 }
 0xf63   :  { %v1198_v16 = vmul.f32 %v2459_v7, %v1196_v13  ;;  %1176 = vrot.lane.b32.xlu1 %v1174_v15, %s2559_s17 }
 0xf65   :  { %1200 = vrot.lane.b32.xlu0 %v1198_v16, %s2559_s17 }
 0xfd3   :  { %v1153_v50 = vpop.permute.xlu0 %1152 }
 0xfd4   :  { %v3183_v51 = vadd.f32 %v1153_v50, %v1145_v48 }
 0xfd5   :  { %v1177_v62 = vpop.permute.xlu1 %1176 }
 0xfd6   :  { %2462 = vtanh.f32 %v3183_v51  ;;  %v3188_v21 = vadd.f32 %v1177_v62, %v1169_v57 }
 0xfd7   :  { %v1201_v20 = vpop.permute.xlu0 %1200 }
 0xfd8   :  { %v3190_v23 = vadd.f32 %v1201_v20, %v1193_v58  ;;  %2464 = vtanh.f32 %v3188_v21 }
 0xfda   :  { %2466 = vtanh.f32 %v3190_v23 }
 0xfe3   :  { %v2463_v41 = vpop.eup %2462 }
 0xfe4   :  { %1158 = vrot.lane.b32.xlu1 %v2463_v41, %s2560_s26 }
 0xfe5   :  { %v2465_v24 = vpop.eup %2464 }
 0xfe6   :  { %1182 = vrot.lane.b32.xlu0 %v2465_v24, %s2560_s26 }
 0xfe7   :  { %v2467_v30 = vpop.eup %2466 }
 0xfe8   :  { %1206 = vrot.lane.b32.xlu1 %v2467_v30, %s2560_s26 }
0x1056   :  { %v1159_v37 = vpop.permute.xlu1 %1158 }
0x1057   :  { %v1161_v38 = vmul.f32 %v2457_v42, %v1159_v37 }
0x1058   :  { %v1183_v31 = vpop.permute.xlu0 %1182 }
0x1059   :  { %1216 = vrot.lane.b32.xlu0 %v1161_v38, %s2559_s17  ;;  %v1185_v22 = vmul.f32 %v2461_v8, %v1183_v31 }
0x105a   :  { %v1207_v40 = vpop.permute.xlu1 %1206 }
0x105b   :  { %v3198_v32 = vmul.f32 %v2459_v7, %v1207_v40  ;;  %1220 = vrot.lane.b32.xlu1 %v1185_v22, %s2560_s26 }
0x105d   :  { %1223 = vrot.lane.b32.xlu0 %v3198_v32, %s2563_s2 }
0x10cb   :  { %v1217_v1 = vpop.permute.xlu0 %1216 }
0x10cd   :  { %v1221_v34 = vpop.permute.xlu1 %1220 }
0x10ce   :  { %v1226_v35 = vsel %vm216_vm1, %v1217_v1, %v1221_v34 }
0x10cf   :  { %v1224_v63 = vpop.permute.xlu0 %1223 }
0x10d0   :  { %v1227_v12 = vsel %vm218_vm2, %v1226_v35, %v1224_v63 }
0x10d1   :  { %v1228_v39 = vpack.c.bf16 %v1227_v12, %v1227_v12 }
0x10d3   :  { %2047 = vmatmul.mubr.msk.bf16.vlgmr.msra.gmra.mxu1 %vm297_vm3, %v1228_v39  ;;  %2247 = vmatmul.mubr.msk.bf16.vlgmr.msra.gmra.mxu0 %vm297_vm3, %v1228_v39 }
0x10d4   :  { %1413 = vmatpush1.bf16.msra.mxu1 %v3088_v17  ;;  %2251 = vmatpush3.bf16.msra.mxu0 %v2841_v54 }
0x10d5   :  { %1414 = vmatprep.subr.bf16.mxu1 %v3095_v18  ;;  %2252 = vmatprep.subr.bf16.mxu0 %v2561_v55 }
0x10d6   :  { %1440 = vmatprep.mubr.bf16.mxu1 %v2558_v2  ;;  %2262 = vmatprep.mubr.msk.bf16.mxu0 %vm2562_vm4, %v2561_v55 }
0x10d8   :  { %1415 = vmatpush1.bf16.msra.mxu1 %v3105_v26  ;;  %2253 = vmatpush3.bf16.msra.mxu0 %v2848_v49 }
0x10d9   :  { %1416 = vmatprep.subr.bf16.mxu1 %v3112_v3  ;;  %2254 = vmatprep.subr.bf16.mxu0 %v2561_v55 }
0x10dc   :  { %1417 = vmatpush1.bf16.msra.mxu1 %v3119_v53  ;;  %2255 = vmatpush3.bf16.msra.mxu0 %v2855_v56 }
0x10dd   :  { %1418 = vmatprep.subr.bf16.mxu1 %v3126_v28  ;;  %2256 = vmatprep.subr.bf16.mxu0 %v2561_v55 }
0x10e0   :  { %1419 = vmatpush1.bf16.msra.mxu1 %v3133_v9  ;;  %2257 = vmatpush3.bf16.msra.mxu0 %v2863_v59 }
0x10e1   :  { %1420 = vmatprep.subr.bf16.mxu1 %v3140_v43  ;;  %2258 = vmatprep.subr.bf16.mxu0 %v2561_v55 }
0x10e4   :  { %1421 = vmatpush1.bf16.msra.mxu1 %v3147_v44  ;;  %2259 = vmatpush3.bf16.msra.mxu0 %v2871_v60 }
0x10e5   :  { %1422 = vmatprep.subr.bf16.mxu1 %v3154_v0  ;;  %2260 = vmatprep.subr.bf16.mxu0 %v2561_v55 }
0x10e8   :  { %1423 = vmatpush1.bf16.msra.mxu1 %v3161_v46  ;;  %2261 = vmatpush3.bf16.msra.mxu0 %v2879_v61 }
0x10e9   :  { %1588 = vmatprep.subr.bf16.mxu1 %v3168_v47  ;;  %2266 = vmatprep.subr.bf16.mxu0 %v2561_v55 }
0x1193   :  { %v1266_v54 = vpop.f32.mrf.mxu1  ;;  %v1307_v49 = vpop.f32.mrf.mxu0 }
0x1194   :  { %v1267_v56 = vadd.f32 %v1266_v54, %v2761_v29  ;;  %v1308_v25 = vadd.f32 %v1307_v49, %v2921_v33 }
0x1195   :  { %v1268_v59 = vpop.f32.mrf.mxu1  ;;  %v2248_v52 = vpop.f32.mrf.mxu0 }
0x1196   :  { %v1313_v60 = vadd.f32 %v1267_v56, %v2816_v14  ;;  %v1269_v4 = vadd.f32 %v1268_v59, %v2819_v19  ;;  %v2051_v11 = vmul.f32 -1.442695, %v1308_v25 }
0x1197   :  { %v1270_v27 = vpop.f32.mrf.mxu1  ;;  %v1310_v42 = vpop.f32.mrf.mxu0 }
0x1198   :  { %2468 = vtanh.f32 %v1313_v60  ;;  %v2049_v14 = vmul.f32 -1.442695, %v1313_v60  ;;  %v2050_v13 = vmul.f32 -1.442695, %v1269_v4 }
0x1199   :  { %v1271_v61 = vpop.f32.mrf.mxu1  ;;  %v2249_v5 = vpop.f32.mrf.mxu0  ;;  %2470 = vtanh.f32 %v1308_v25 }
0x119a   :  { %2472 = vtanh.f32 %v1269_v4 }
0x119b   :  { %2474 = vpow2.f32 %v2049_v14 }
0x119c   :  { %2476 = vpow2.f32 %v2051_v11 }
0x119d   :  { %2478 = vpow2.f32 %v2050_v13 }
0x11a5   :  { %v2469_v47 = vpop.eup %2468 }
0x11a6   :  { %1323 = vrot.lane.b32.xlu1 %v2469_v47, %s2560_s26  ;;  %v2471_v7 = vpop.eup %2470 }
0x11a7   :  { %v2473_v8 = vpop.eup %2472 }
0x11a8   :  { %1347 = vrot.lane.b32.xlu0 %v2473_v8, %s2560_s26  ;;  %v2475_v15 = vpop.eup %2474  ;;  %v3273_v8 = vld [vmem:[%s3508_s4 + $0x80] ss:$12 sps:$4 sm:$0xff]  }
0x11a9   :  { %v2477_v16 = vpop.eup %2476  ;;  %v1317_v48 = vadd.f32 1.0, %v2475_v15 }
0x11aa   :  { %1371 = vrot.lane.b32.xlu1 %v2471_v7, %s2560_s26  ;;  %v2479_v50 = vpop.eup %2478  ;;  %v1365_v57 = vadd.f32 1.0, %v2477_v16 }
0x11ab   :  { %2480 = vrcp.f32 %v1317_v48  ;;  %v1341_v58 = vadd.f32 1.0, %v2479_v50 }
0x11ac   :  { %2482 = vrcp.f32 %v1365_v57 }
0x11ad   :  { %2484 = vrcp.f32 %v1341_v58 }
0x11b8   :  { %v2481_v62 = vpop.eup %2480 }
0x11b9   :  { %v2483_v24 = vpop.eup %2482  ;;  %v1321_v40 = vmul.f32 %v2481_v62, %v3183_v51 }
0x11ba   :  { %v2485_v30 = vpop.eup %2484  ;;  %v1369_v63 = vmul.f32 %v2483_v24, %v3190_v23 }
0x11bb   :  { %v1345_v35 = vmul.f32 %v2485_v30, %v3188_v21 }
0x1218   :  { %v1324_v20 = vpop.permute.xlu1 %1323 }
0x1219   :  { %v1326_v41 = vmul.f32 %v2481_v62, %v1324_v20 }
0x121a   :  { %v1348_v37 = vpop.permute.xlu0 %1347 }
0x121b   :  { %1328 = vrot.lane.b32.xlu0 %v1326_v41, %s2559_s17  ;;  %v1350_v31 = vmul.f32 %v2485_v30, %v1348_v37 }
0x121c   :  { %v1372_v38 = vpop.permute.xlu1 %1371 }
0x121d   :  { %v1374_v22 = vmul.f32 %v2483_v24, %v1372_v38  ;;  %1352 = vrot.lane.b32.xlu1 %v1350_v31, %s2559_s17 }
0x121f   :  { %1376 = vrot.lane.b32.xlu0 %v1374_v22, %s2559_s17 }
0x128d   :  { %v1329_v1 = vpop.permute.xlu0 %1328 }
0x128e   :  { %v3245_v34 = vadd.f32 %v1329_v1, %v1321_v40 }
0x128f   :  { %v1353_v12 = vpop.permute.xlu1 %1352 }
0x1290   :  { %2486 = vtanh.f32 %v3245_v34  ;;  %v3250_v54 = vadd.f32 %v1353_v12, %v1345_v35 }
0x1291   :  { %v1377_v39 = vpop.permute.xlu0 %1376 }
0x1292   :  { %v3252_v49 = vadd.f32 %v1377_v39, %v1369_v63  ;;  %2488 = vtanh.f32 %v3250_v54 }
0x1294   :  { %2490 = vtanh.f32 %v3252_v49 }
0x129d   :  { %v2487_v51 = vpop.eup %2486 }
0x129e   :  { %1334 = vrot.lane.b32.xlu1 %v2487_v51, %s2560_s26 }
0x129f   :  { %v2489_v56 = vpop.eup %2488 }
0x12a0   :  { %1358 = vrot.lane.b32.xlu0 %v2489_v56, %s2560_s26 }
0x12a1   :  { %v2491_v59 = vpop.eup %2490 }
0x12a2   :  { %1382 = vrot.lane.b32.xlu1 %v2491_v59, %s2560_s26 }
0x1310   :  { %v1335_v21 = vpop.permute.xlu1 %1334 }
0x1311   :  { %v1337_v23 = vmul.f32 %v2481_v62, %v1335_v21 }
0x1312   :  { %v1359_v52 = vpop.permute.xlu0 %1358 }
0x1313   :  { %1392 = vrot.lane.b32.xlu0 %v1337_v23, %s2559_s17  ;;  %v1361_v60 = vmul.f32 %v2485_v30, %v1359_v52 }
0x1314   :  { %v1383_v25 = vpop.permute.xlu1 %1382 }
0x1315   :  { %v3260_v27 = vmul.f32 %v2483_v24, %v1383_v25  ;;  %1396 = vrot.lane.b32.xlu1 %v1361_v60, %s2560_s26 }
0x1317   :  { %1399 = vrot.lane.b32.xlu0 %v3260_v27, %s2563_s2 }
0x1385   :  { %v1393_v42 = vpop.permute.xlu0 %1392 }
0x1387   :  { %v1397_v4 = vpop.permute.xlu1 %1396 }
0x1388   :  { %v1402_v61 = vsel %vm216_vm1, %v1393_v42, %v1397_v4 }
0x1389   :  { %v1400_v5 = vpop.permute.xlu0 %1399 }
0x138a   :  { %v1403_v47 = vsel %vm218_vm2, %v1402_v61, %v1400_v5 }
0x138b   :  { %v1404_v7 = vpack.c.bf16 %v1403_v47, %v1403_v47 }
0x138d   :  { %2052 = vmatmul.mubr.msk.bf16.vlgmr.msra.gmra.mxu1 %vm297_vm3, %v1404_v7  ;;  %2263 = vmatmul.mubr.msk.bf16.vlgmr.msra.gmra.mxu0 %vm297_vm3, %v1404_v7 }
0x138e   :  { %1589 = vmatpush1.bf16.msra.mxu1 %v3088_v17  ;;  %2267 = vmatpush3.bf16.msra.mxu0 %v3273_v8  ;;  %v3285_v17 = vld [vmem:[%s3508_s4 + $0x68] ss:$12 sps:$4 sm:$0xff]  }
0x138f   :  { %1590 = vmatprep.subr.bf16.mxu1 %v3095_v18  ;;  %2268 = vmatprep.subr.bf16.mxu0 %v2561_v55  ;;  %v3303_v18 = vld [vmem:[%s3508_s4 + $0x38] ss:$12 sps:$4 sm:$0xff]  }
0x1390   :  { %1616 = vmatprep.mubr.bf16.mxu1 %v2558_v2  ;;  %2278 = vmatprep.mubr.msk.bf16.mxu0 %vm2562_vm4, %v2561_v55  ;;  %v3294_v2 = vld [vmem:[%s3508_s4 + $0x50] ss:$12 sps:$4 sm:$0xff]  }
0x1392   :  { %1591 = vmatpush1.bf16.msra.mxu1 %v3105_v26  ;;  %2269 = vmatpush3.bf16.msra.mxu0 %v3285_v17  ;;  %v3312_v26 = vld [vmem:[%s3508_s4 + $0x20] ss:$12 sps:$4 sm:$0xff]  }
0x1393   :  { %1592 = vmatprep.subr.bf16.mxu1 %v3112_v3  ;;  %2270 = vmatprep.subr.bf16.mxu0 %v2561_v55  ;;  %v3321_v3 = vld [vmem:[%s3508_s4 + $0x8] ss:$12 sps:$4 sm:$0xff]  }
0x1396   :  { %1593 = vmatpush1.bf16.msra.mxu1 %v3119_v53  ;;  %2271 = vmatpush3.bf16.msra.mxu0 %v3294_v2 }
0x1397   :  { %1594 = vmatprep.subr.bf16.mxu1 %v3126_v28  ;;  %2272 = vmatprep.subr.bf16.mxu0 %v2561_v55 }
0x139a   :  { %1595 = vmatpush1.bf16.msra.mxu1 %v3133_v9  ;;  %2273 = vmatpush3.bf16.msra.mxu0 %v3303_v18 }
0x139b   :  { %1596 = vmatprep.subr.bf16.mxu1 %v3140_v43  ;;  %2274 = vmatprep.subr.bf16.mxu0 %v2561_v55 }
0x139e   :  { %1597 = vmatpush1.bf16.msra.mxu1 %v3147_v44  ;;  %2275 = vmatpush3.bf16.msra.mxu0 %v3312_v26 }
0x139f   :  { %1598 = vmatprep.subr.bf16.mxu1 %v3154_v0  ;;  %2276 = vmatprep.subr.bf16.mxu0 %v2561_v55 }
0x13a2   :  { %1599 = vmatpush1.bf16.msra.mxu1 %v3161_v46  ;;  %2277 = vmatpush3.bf16.msra.mxu0 %v3321_v3 }
0x13a3   :  { %2282 = vmatprep.subr.bf16.mxu1 %v2561_v55 }
0x144d   :  { %v1442_v53 = vpop.f32.mrf.mxu1  ;;  %v1483_v28 = vpop.f32.mrf.mxu0 }
0x144e   :  { %v1443_v9 = vadd.f32 %v1442_v53, %v2761_v29  ;;  %v1484_v14 = vadd.f32 %v1483_v28, %v2921_v33 }
0x144f   :  { %v1444_v43 = vpop.f32.mrf.mxu1  ;;  %v2264_v44 = vpop.f32.mrf.mxu0 }
0x1450   :  { %v1489_v0 = vadd.f32 %v2813_v10, %v1443_v9  ;;  %v1445_v13 = vadd.f32 %v1444_v43, %v2819_v19  ;;  %v2056_v57 = vmul.f32 -1.442695, %v1484_v14 }
0x1451   :  { %v1446_v46 = vpop.f32.mrf.mxu1  ;;  %v1486_v11 = vpop.f32.mrf.mxu0 }
0x1452   :  { %2492 = vtanh.f32 %v1489_v0  ;;  %v2054_v10 = vmul.f32 -1.442695, %v1489_v0  ;;  %v2055_v58 = vmul.f32 -1.442695, %v1445_v13 }
0x1453   :  { %v1447_v15 = vpop.f32.mrf.mxu1  ;;  %v2265_v16 = vpop.f32.mrf.mxu0  ;;  %2494 = vtanh.f32 %v1484_v14 }
0x1454   :  { %2496 = vtanh.f32 %v1445_v13 }
0x1455   :  { %2498 = vpow2.f32 %v2054_v10 }
0x1456   :  { %2500 = vpow2.f32 %v2056_v57 }
0x1457   :  { %2502 = vpow2.f32 %v2055_v58 }
0x145f   :  { %v2493_v48 = vpop.eup %2492 }
0x1460   :  { %1499 = vrot.lane.b32.xlu1 %v2493_v48, %s2560_s26  ;;  %v2495_v50 = vpop.eup %2494 }
0x1461   :  { %v2497_v29 = vpop.eup %2496 }
0x1462   :  { %1523 = vrot.lane.b32.xlu0 %v2497_v29, %s2560_s26  ;;  %v2499_v62 = vpop.eup %2498 }
0x1463   :  { %v2501_v20 = vpop.eup %2500  ;;  %v1493_v41 = vadd.f32 1.0, %v2499_v62 }
0x1464   :  { %1547 = vrot.lane.b32.xlu1 %v2495_v50, %s2560_s26  ;;  %v2503_v24 = vpop.eup %2502  ;;  %v1541_v30 = vadd.f32 1.0, %v2501_v20 }
0x1465   :  { %2504 = vrcp.f32 %v1493_v41  ;;  %v1517_v37 = vadd.f32 1.0, %v2503_v24 }
0x1466   :  { %2506 = vrcp.f32 %v1541_v30 }
0x1467   :  { %2508 = vrcp.f32 %v1517_v37 }
0x1472   :  { %v2505_v38 = vpop.eup %2504 }
0x1473   :  { %v2507_v40 = vpop.eup %2506  ;;  %v1497_v51 = vmul.f32 %v2505_v38, %v3245_v34 }
0x1474   :  { %v2509_v1 = vpop.eup %2508  ;;  %v1545_v23 = vmul.f32 %v2507_v40, %v3252_v49 }
0x1475   :  { %v1521_v21 = vmul.f32 %v2509_v1, %v3250_v54 }
0x14d2   :  { %v1500_v31 = vpop.permute.xlu1 %1499 }
0x14d3   :  { %v1502_v22 = vmul.f32 %v2505_v38, %v1500_v31 }
0x14d4   :  { %v1524_v35 = vpop.permute.xlu0 %1523 }
0x14d5   :  { %1504 = vrot.lane.b32.xlu0 %v1502_v22, %s2559_s17  ;;  %v1526_v12 = vmul.f32 %v2509_v1, %v1524_v35 }
0x14d6   :  { %v1548_v63 = vpop.permute.xlu1 %1547 }
0x14d7   :  { %v1550_v39 = vmul.f32 %v2507_v40, %v1548_v63  ;;  %1528 = vrot.lane.b32.xlu1 %v1526_v12, %s2559_s17 }
0x14d9   :  { %1552 = vrot.lane.b32.xlu0 %v1550_v39, %s2559_s17 }
0x1547   :  { %v1505_v56 = vpop.permute.xlu0 %1504 }
0x1548   :  { %v3336_v59 = vadd.f32 %v1505_v56, %v1497_v51 }
0x1549   :  { %v1529_v52 = vpop.permute.xlu1 %1528 }
0x154a   :  { %2510 = vtanh.f32 %v3336_v59  ;;  %v3341_v25 = vadd.f32 %v1529_v52, %v1521_v21 }
0x154b   :  { %v1553_v60 = vpop.permute.xlu0 %1552 }
0x154c   :  { %v3343_v42 = vadd.f32 %v1553_v60, %v1545_v23  ;;  %2512 = vtanh.f32 %v3341_v25 }
0x154e   :  { %2514 = vtanh.f32 %v3343_v42 }
0x1557   :  { %v2511_v34 = vpop.eup %2510 }
0x1558   :  { %1510 = vrot.lane.b32.xlu1 %v2511_v34, %s2560_s26 }
0x1559   :  { %v2513_v4 = vpop.eup %2512 }
0x155a   :  { %1534 = vrot.lane.b32.xlu0 %v2513_v4, %s2560_s26 }
0x155b   :  { %v2515_v61 = vpop.eup %2514 }
0x155c   :  { %1558 = vrot.lane.b32.xlu1 %v2515_v61, %s2560_s26 }
0x15ca   :  { %v1511_v54 = vpop.permute.xlu1 %1510 }
0x15cb   :  { %v1513_v49 = vmul.f32 %v2505_v38, %v1511_v54 }
0x15cc   :  { %v1535_v5 = vpop.permute.xlu0 %1534 }
0x15cd   :  { %1568 = vrot.lane.b32.xlu0 %v1513_v49, %s2559_s17  ;;  %v1537_v47 = vmul.f32 %v2509_v1, %v1535_v5 }
0x15ce   :  { %v1559_v7 = vpop.permute.xlu1 %1558 }
0x15cf   :  { %v3351_v53 = vmul.f32 %v2507_v40, %v1559_v7  ;;  %1572 = vrot.lane.b32.xlu1 %v1537_v47, %s2560_s26 }
0x15d1   :  { %1575 = vrot.lane.b32.xlu0 %v3351_v53, %s2563_s2 }
0x163f   :  { %v3356_v28 = vpop.permute.xlu0 %1568 }
0x1640   :  { %1799 = vst.msk [vmem:[%s3513_s9] sm:$0xff] %vm216_vm1, %v3356_v28 }
0x1641   :  { %v1573_v9 = vpop.permute.xlu1 %1572 }
0x1642   :  { %v1578_v43 = vsel %vm216_vm1, %v3356_v28, %v1573_v9 }
0x1643   :  { %v1576_v44 = vpop.permute.xlu0 %1575 }
0x1644   :  { %v1579_v0 = vsel %vm218_vm2, %v1578_v43, %v1576_v44 }
0x1645   :  { %v1580_v14 = vpack.c.bf16 %v1579_v0, %v1579_v0 }
0x1647   :  { %2057 = vmatmul.mubr.msk.bf16.vlgmr.msra.gmra.mxu1 %vm297_vm3, %v1580_v14  ;;  %2279 = vmatmul.mubr.msk.bf16.vlgmr.msra.gmra.mxu0 %vm297_vm3, %v1580_v14 }
0x1648   :  { %2283 = vmatpush3.bf16.msra.mxu1 %v3273_v8  ;;  %2294 = vmatprep.mubr.msk.bf16.mxu1 %vm2562_vm4, %v2561_v55 }
0x1649   :  { %2284 = vmatprep.subr.bf16.mxu1 %v2561_v55 }
0x164c   :  { %2285 = vmatpush3.bf16.msra.mxu1 %v3285_v17 }
0x164d   :  { %2286 = vmatprep.subr.bf16.mxu1 %v2561_v55 }
0x1650   :  { %2287 = vmatpush3.bf16.msra.mxu1 %v3294_v2 }
0x1651   :  { %2288 = vmatprep.subr.bf16.mxu1 %v2561_v55 }
0x1654   :  { %2289 = vmatpush3.bf16.msra.mxu1 %v3303_v18 }
0x1655   :  { %2290 = vmatprep.subr.bf16.mxu1 %v2561_v55 }
0x1658   :  { %2291 = vmatpush3.bf16.msra.mxu1 %v3312_v26 }
0x1659   :  { %2292 = vmatprep.subr.bf16.mxu1 %v2561_v55 }
0x165c   :  { %2293 = vmatpush3.bf16.msra.mxu1 %v3321_v3 }
0x1707   :  { %v1618_v8 = vpop.f32.mrf.mxu1  ;;  %v1658_v46 = vpop.f32.mrf.mxu0 }
0x1708   :  { %v1659_v17 = vadd.f32 %v1658_v46, %v2921_v33  ;;  %v1833_v46 = vld [vmem:[%s3514_s6 + $0x8] sm:$0xff] }
0x1709   :  { %v1619_v11 = vpop.f32.mrf.mxu1  ;;  %v2280_v13 = vpop.f32.mrf.mxu0 }
0x170a   :  { %2516 = vtanh.f32 %v1659_v17  ;;  %v1620_v2 = vadd.f32 %v1619_v11, %v2819_v19  ;;  %v2060_v26 = vmul.f32 -1.442695, %v1659_v17  ;;  %v1832_v17 = vld [vmem:[%s3514_s6] sm:$0xff] }
0x170b   :  { %v1621_v15 = vpop.f32.mrf.mxu1  ;;  %v1661_v16 = vpop.f32.mrf.mxu0 }
0x170c   :  { %2518 = vtanh.f32 %v1620_v2  ;;  %v2059_v3 = vmul.f32 -1.442695, %v1620_v2 }
0x170d   :  { %v1622_v18 = vpop.f32.mrf.mxu1  ;;  %v2281_v48 = vpop.f32.mrf.mxu0  ;;  %2520 = vpow2.f32 %v2060_v26 }
0x170e   :  { %2522 = vpow2.f32 %v2059_v3 }
0x1717   :  { %v2517_v50 = vpop.eup %2516 }
0x1718   :  { %1697 = vrot.lane.b32.xlu0 %v2517_v50, %s2560_s26 }
0x1719   :  { %v2519_v55 = vpop.eup %2518 }
0x171a   :  { %1673 = vrot.lane.b32.xlu1 %v2519_v55, %s2560_s26  ;;  %v2521_v29 = vpop.eup %2520 }
0x171b   :  { %v2523_v10 = vpop.eup %2522  ;;  %v1691_v57 = vadd.f32 1.0, %v2521_v29 }
0x171c   :  { %v1667_v58 = vadd.f32 1.0, %v2523_v10 }
0x171d   :  { %2524 = vrcp.f32 %v1691_v57 }
0x171e   :  { %2526 = vrcp.f32 %v1667_v58 }
0x172a   :  { %v2525_v19 = vpop.eup %2524 }
0x172b   :  { %v2527_v41 = vpop.eup %2526  ;;  %v1695_v37 = vmul.f32 %v2525_v19, %v3343_v42 }
0x172c   :  { %v1671_v22 = vmul.f32 %v2527_v41, %v3341_v25 }
0x178a   :  { %v1698_v62 = vpop.permute.xlu0 %1697 }
0x178b   :  { %v1700_v20 = vmul.f32 %v2525_v19, %v1698_v62  ;;  %v2067_v62 = vld [vmem:[%s3516_s7] ss:$0 sm:$0xff] }
0x178c   :  { %v1674_v24 = vpop.permute.xlu1 %1673 }
0x178d   :  { %1702 = vrot.lane.b32.xlu0 %v1700_v20, %s2559_s17  ;;  %v1676_v30 = vmul.f32 %v2527_v41, %v1674_v24 }
0x178f   :  { %1678 = vrot.lane.b32.xlu1 %v1676_v30, %s2559_s17 }
0x17ff   :  { %v1703_v38 = vpop.permute.xlu0 %1702 }
0x1800   :  { %v1705_v31 = vadd.f32 %v1703_v38, %v1695_v37 }
0x1801   :  { %v1679_v40 = vpop.permute.xlu1 %1678 }
0x1802   :  { %2528 = vtanh.f32 %v1705_v31  ;;  %v1681_v1 = vadd.f32 %v1679_v40, %v1671_v22 }
0x1804   :  { %2530 = vtanh.f32 %v1681_v1 }
0x180f   :  { %v2529_v35 = vpop.eup %2528 }
0x1810   :  { %1708 = vrot.lane.b32.xlu0 %v2529_v35, %s2560_s26 }
0x1811   :  { %v2531_v63 = vpop.eup %2530 }
0x1812   :  { %1684 = vrot.lane.b32.xlu1 %v2531_v63, %s2560_s26 }
0x1882   :  { %v1709_v12 = vpop.permute.xlu0 %1708 }
0x1883   :  { %v1711_v39 = vmul.f32 %v2525_v19, %v1709_v12 }
0x1884   :  { %v1685_v51 = vpop.permute.xlu1 %1684 }
0x1885   :  { %1721 = vrot.lane.b32.xlu0 %v1711_v39, %s2563_s2  ;;  %v3392_v56 = vmul.f32 %v2527_v41, %v1685_v51 }
0x1887   :  { %1718 = vrot.lane.b32.xlu1 %v3392_v56, %s2560_s26 }
0x18f7   :  { %v1722_v23 = vpop.permute.xlu0 %1721 }
0x18f9   :  { %v1719_v21 = vpop.permute.xlu1 %1718 }
0x18fa   :  { %v1724_v52 = vsel %vm216_vm1, %v3356_v28, %v1719_v21 }
0x18fb   :  { %v1725_v60 = vsel %vm218_vm2, %v1724_v52, %v1722_v23 }
0x18fc   :  { %v1726_v25 = vpack.c.bf16 %v1725_v60, %v1725_v60 }
0x18fe   :  { %2295 = vmatmul.mubr.msk.bf16.vlgmr.msra.gmra.mxu1 %vm297_vm3, %v1726_v25 }
0x19be   :  { %v1764_v42 = vpop.f32.mrf.mxu1 }
0x19bf   :  { %v1765_v34 = vadd.f32 %v1764_v42, %v2921_v33 }
0x19c0   :  { %v2296_v4 = vpop.f32.mrf.mxu1 }
0x19c1   :  { %2532 = vtanh.f32 %v1765_v34  ;;  %v2062_v5 = vmul.f32 -1.442695, %v1765_v34 }
0x19c2   :  { %v1767_v61 = vpop.f32.mrf.mxu1 }
0x19c3   :  { %2534 = vpow2.f32 %v2062_v5 }
0x19c4   :  { %v2297_v54 = vpop.f32.mrf.mxu1 }
0x19ce   :  { %v2533_v49 = vpop.eup %2532 }
0x19cf   :  { %1779 = vrot.lane.b32.xlu1 %v2533_v49, %s2560_s26 }
0x19d0   :  { %v2535_v47 = vpop.eup %2534 }
0x19d1   :  { %v1773_v7 = vadd.f32 1.0, %v2535_v47 }
0x19d3   :  { %2536 = vrcp.f32 %v1773_v7 }
0x19e0   :  { %v2537_v28 = vpop.eup %2536 }
0x19e1   :  { %v1777_v33 = vmul.f32 %v2537_v28, %v1705_v31 }
0x1a41   :  { %v1780_v9 = vpop.permute.xlu1 %1779 }
0x1a42   :  { %v1782_v43 = vmul.f32 %v2537_v28, %v1780_v9 }
0x1a44   :  { %1784 = vrot.lane.b32.xlu0 %v1782_v43, %s2559_s17 }
0x1a48   :  { %683 = vrot.lane.b32.xlu0 %v2952_v45, %s2559_s17 }
0x1a4c   :  { %1035 = vrot.lane.b32.xlu0 %v3076_v6, %s2559_s17  ;;  %v1835_v6 = vld [vmem:[%s3514_s6 + $0x18] sm:$0xff] }
0x1a4d   :  { %2298 = vmatprep.subr.mxu0 %v1835_v6 }
0x1a4e   :  { %2299 = vmatpush3.msra.mxu0 %v1835_v6 }
0x1a50   :  { %1387 = vrot.lane.b32.xlu0 %v3260_v27, %s2559_s17  ;;  %v1834_v27 = vld [vmem:[%s3514_s6 + $0x10] sm:$0xff] }
0x1a51   :  { %2300 = vmatprep.subr.mxu0 %v1834_v27 }
0x1a52   :  { %2301 = vmatpush3.msra.mxu0 %v1834_v27 }
0x1a53   :  { %2302 = vmatprep.subr.mxu0 %v1833_v46 }
0x1a54   :  { %1713 = vrot.lane.b32.xlu0 %v1711_v39, %s2559_s17  ;;  %2303 = vmatpush3.msra.mxu0 %v1833_v46 }
0x1a55   :  { %2304 = vmatprep.subr.mxu0 %v1832_v17 }
0x1a56   :  { %2305 = vmatpush3.msra.mxu0 %v1832_v17 }
0x1a58   :  { %1801 = vrot.lane.b32.xlu0 %v3336_v59, %s2563_s2 }
0x1a5c   :  { %1811 = vrot.lane.b32.xlu0 %v1681_v1, %s2563_s2 }
0x1ab6   :  { %v1785_v44 = vpop.permute.xlu0 %1784 }
0x1ab7   :  { %v1787_v0 = vadd.f32 %v1785_v44, %v1777_v33 }
0x1ab9   :  { %2538 = vtanh.f32 %v1787_v0 }
0x1aba   :  { %v684_v14 = vpop.permute.xlu0 %683 }
0x1abb   :  { %686 = vst.msk [vmem:[#allocation2] sm:$0xff] %vm216_vm1, %v684_v14 }
0x1abe   :  { %v1036_v45 = vpop.permute.xlu0 %1035 }
0x1abf   :  { %1038 = vst.msk [vmem:[#allocation2 + $0x10] sm:$0xff] %vm216_vm1, %v1036_v45 }
0x1ac2   :  { %v1388_v59 = vpop.permute.xlu0 %1387  ;;  %v1824_v8 = vld [vmem:[#allocation2] sm:$0xff] }
0x1ac3   :  { %1390 = vst.msk [vmem:[#allocation2 + $0x20] sm:$0xff] %vm216_vm1, %v1388_v59  ;;  %2306 = vmatprep.mubr.msk.f32.mxu0 %vm216_vm1, %v1824_v8 }
0x1ac6   :  { %v2539_v11 = vpop.eup %2538  ;;  %v1714_v13 = vpop.permute.xlu0 %1713 }
0x1ac7   :  { %1716 = vst.msk [vmem:[#allocation2 + $0x30] sm:$0xff] %vm216_vm1, %v1714_v13  ;;  %1790 = vrot.lane.b32.xlu1 %v2539_v11, %s2560_s26 }
0x1aca   :  { %v1802_v2 = vpop.permute.xlu0 %1801  ;;  %v1828_v26 = vld [vmem:[#allocation2 + $0x20] sm:$0xff] }
0x1acb   :  { %1804 = vst.msk [vmem:[%s3515_s10] sm:$0xff] %vm216_vm1, %v1802_v2  ;;  %859 = vrot.lane.b32.xlu1 %v3014_v36, %s2559_s17 }
0x1ace   :  { %v1812_v15 = vpop.permute.xlu0 %1811  ;;  %v1830_v29 = vld [vmem:[#allocation2 + $0x30] sm:$0xff] }
0x1acf   :  { %2064 = vst.msk [vmem:[%s3515_s10 + $0x8] sm:$0xff] %vm216_vm1, %v1812_v15  ;;  %1211 = vrot.lane.b32.xlu1 %v3198_v32, %s2559_s17 }
0x1ad3   :  { %1563 = vrot.lane.b32.xlu1 %v3351_v53, %s2559_s17  ;;  %v1826_v53 = vld [vmem:[#allocation2 + $0x10] sm:$0xff] }
0x1b39   :  { %v1791_v16 = vpop.permute.xlu1 %1790 }
0x1b3a   :  { %v1793_v18 = vmul.f32 %v2537_v28, %v1791_v16 }
0x1b3c   :  { %1795 = vrot.lane.b32.xlu1 %v1793_v18, %s2559_s17 }
0x1b3d   :  { %v860_v48 = vpop.permute.xlu1 %859 }
0x1b3e   :  { %862 = vst.msk [vmem:[#allocation2 + $0x8] sm:$0xff] %vm216_vm1, %v860_v48 }
0x1b40   :  { %1805 = vrot.lane.b32.xlu1 %v3392_v56, %s2559_s17 }
0x1b41   :  { %v1212_v36 = vpop.permute.xlu1 %1211 }
0x1b42   :  { %1214 = vst.msk [vmem:[#allocation2 + $0x18] sm:$0xff] %vm216_vm1, %v1212_v36 }
0x1b44   :  { %1819 = vrot.lane.b32.xlu1 %v1787_v0, %s2563_s2 }
0x1b45   :  { %v1564_v50 = vpop.permute.xlu1 %1563  ;;  %v1825_v32 = vld [vmem:[#allocation2 + $0x8] sm:$0xff] }
0x1b46   :  { %1566 = vst.msk [vmem:[#allocation2 + $0x28] sm:$0xff] %vm216_vm1, %v1564_v50  ;;  %2307 = vmatmul.mubr.msk.f32.vlgmr.msra.gmra.mxu0 %vm216_vm1, %v1825_v32 }
0x1b47   :  { %2309 = vmatprep.mubr.msk.f32.mxu0 %vm216_vm1, %v1826_v53 }
0x1b49   :  { %v1827_v55 = vld [vmem:[#allocation2 + $0x18] sm:$0xff] }
0x1b4a   :  { %2310 = vmatmul.mubr.msk.f32.gmra.mxu0 %vm216_vm1, %v1827_v55 }
0x1b4b   :  { %2312 = vmatprep.mubr.msk.f32.mxu0 %vm216_vm1, %v1828_v26 }
0x1b4d   :  { %v1829_v3 = vld [vmem:[#allocation2 + $0x28] sm:$0xff] }
0x1b4e   :  { %2313 = vmatmul.mubr.msk.f32.gmra.mxu0 %vm216_vm1, %v1829_v3 }
0x1b4f   :  { %2315 = vmatprep.mubr.msk.f32.mxu0 %vm216_vm1, %v1830_v29 }
0x1bae   :  { %v1796_v10 = vpop.permute.xlu1 %1795 }
0x1baf   :  { %1798 = vst.msk [vmem:[#allocation2 + $0x38] sm:$0xff] %vm216_vm1, %v1796_v10  ;;  %2065 = vst.msk [vmem:[%s3513_s9 + $0x10] sm:$0xff] %vm216_vm1, %v1796_v10 }
0x1bb2   :  { %v1806_v57 = vpop.permute.xlu1 %1805 }
0x1bb3   :  { %2063 = vst.msk [vmem:[%s3513_s9 + $0x8] sm:$0xff] %vm216_vm1, %v1806_v57 }
0x1bb6   :  { %v1820_v58 = vpop.permute.xlu1 %1819  ;;  %v1831_v19 = vld [vmem:[#allocation2 + $0x38] sm:$0xff] }
0x1bb7   :  { %2066 = vst.msk [vmem:[%s3515_s10 + $0x10] sm:$0xff] %vm216_vm1, %v1820_v58  ;;  %2316 = vmatmul.mubr.msk.f32.gmra.mxu0 %vm216_vm1, %v1831_v19 }
0x1c06   :  { %v2308_v20 = vpop.f32.mrf.mxu0 }
0x1c07   :  { %v1939_v41 = vadd.f32 %v2308_v20, %v2067_v62 }
0x1c08   :  { %v1933_v24 = vpop.f32.mrf.mxu0 }
0x1c09   :  { %1973 = vst.msk [vmem:[%s3517_s8 + $0x8] sm:$0xff] %vm43_vm0, %v1939_v41  ;;  %v1934_v30 = vadd.f32 %v2067_v62, %v1933_v24 }
0x1c0a   :  { %v2311_v37 = vpop.f32.mrf.mxu0 }
0x1c0b   :  { %1972 = vst.msk [vmem:[%s3517_s8] sm:$0xff] %vm43_vm0, %v1934_v30  ;;  %v1949_v38 = vadd.f32 %v2311_v37, %v2067_v62 }
0x1c0c   :  { %v1943_v31 = vpop.f32.mrf.mxu0 }
0x1c0d   :  { %1975 = vst.msk [vmem:[%s3517_s8 + $0x18] sm:$0xff] %vm43_vm0, %v1949_v38  ;;  %v1944_v22 = vadd.f32 %v2067_v62, %v1943_v31 }
0x1c0e   :  { %v2314_v40 = vpop.f32.mrf.mxu0 }
0x1c0f   :  { %1974 = vst.msk [vmem:[%s3517_s8 + $0x10] sm:$0xff] %vm43_vm0, %v1944_v22  ;;  %v1959_v1 = vadd.f32 %v2314_v40, %v2067_v62 }
0x1c10   :  { %v1953_v35 = vpop.f32.mrf.mxu0 }
0x1c11   :  { %1977 = vst.msk [vmem:[%s3517_s8 + $0x28] sm:$0xff] %vm43_vm0, %v1959_v1  ;;  %v1954_v63 = vadd.f32 %v2067_v62, %v1953_v35 }
0x1c13   :  { %1976 = vst.msk [vmem:[%s3517_s8 + $0x20] sm:$0xff] %vm43_vm0, %v1954_v63 }
0x1c77   :  { %v2317_v12 = vpop.f32.mrf.mxu0 }
0x1c78   :  { %v1969_v39 = vadd.f32 %v2317_v12, %v2067_v62 }
0x1c79   :  { %v1963_v51 = vpop.f32.mrf.mxu0 }
0x1c7a   :  { %1979 = vst.msk [vmem:[%s3517_s8 + $0x38] sm:$0xff] %vm43_vm0, %v1969_v39  ;;  %v1964_v56 = vadd.f32 %v2067_v62, %v1963_v51 }
0x1c7c   :  { %1978 = vst.msk [vmem:[%s3517_s8 + $0x30] sm:$0xff] %vm43_vm0, %v1964_v56 }

</bundles_post_ra>
